<compile_context>
chip_gen: v7x
topology: tpu7x:2x2x1
jax: 0.10.0
libtpu: 0.0.40
codegen_flags: <defaults>
</compile_context>

<pallas_src>
import math

import numpy as np
import jax
import jax.numpy as jnp
from jax import lax
from jax.experimental import pallas as pl
from jax.experimental.pallas import tpu as pltpu

WINDOW_SIZE = 11
SIGMA = 1.5
_C1 = 0.01 ** 2
_C2 = 0.03 ** 2


def _gaussian_1d(window_size, sigma):
    g = np.array(
        [math.exp(-((x - window_size // 2) ** 2) / float(2 * sigma ** 2))
         for x in range(window_size)],
        dtype=np.float32,
    )
    return g / g.sum()


def _conv_matrix(g, in_len, out_len, pad, out_len_padded):
    """Banded matrix (out_len_padded, in_len): M @ x == 1-D conv w/ zero padding.

    Rows >= out_len are exactly zero, so the corresponding "fake" output pixels
    blur to 0 for every map and yield ssim == 1 (corrected in the wrapper).
    """
    ws = g.shape[0]
    m = np.zeros((out_len_padded, in_len), dtype=np.float32)
    for o in range(out_len):
        for k in range(ws):
            i = o + k - pad
            if 0 <= i < in_len:
                m[o, i] = g[k]
    return m


def _round_up(v, m):
    return -(-v // m) * m


def _split_bf16_host(x_f32):
    """Split an f32 array into (hi, lo) bf16 parts with hi + lo ~= x (~2^-17)."""
    hi = x_f32.astype(jnp.bfloat16)
    lo = (x_f32 - hi.astype(jnp.float32)).astype(jnp.bfloat16)
    return hi, lo


def _make_ssim_kernel(tb, h, w, out_hp, out_wp):
    f32 = jnp.float32
    bf16 = jnp.bfloat16
    dn = (((2,), (2,)), ((0,), (0,)))      # contract last dims, batch dim 0

    def split(x):                          # in-kernel bf16 hi/lo operand split
        hi = x.astype(bf16)
        lo = (x - hi.astype(f32)).astype(bf16)
        return hi, lo

    def kernel(x1_ref, x2_ref, growhi_ref, growlo_ref, gchi_ref, gclo_ref,
               out_ref):
        x1 = x1_ref[...].astype(f32)                        # (tb, h, w)
        x2 = x2_ref[...].astype(f32)

        # Row-blur weights: broadcast once (hoisted; bf16 hi+lo pair costs the
        # same bytes as one f32 copy).  Column-blur weights stay 2-D/stationary.
        grow_hi = jnp.broadcast_to(growhi_ref[...], (tb, out_wp, w))
        grow_lo = jnp.broadcast_to(growlo_ref[...], (tb, out_wp, w))
        gcol_hi = gchi_ref[...]                             # (h, out_hp) bf16
        gcol_lo = gclo_ref[...]

        def bdot(a, b):                                     # batched MXU matmul
            return lax.dot_general(a, b, dn, preferred_element_type=f32)

        def mdot(a, b):                                     # plain 2-D MXU matmul
            return jnp.dot(a, b, preferred_element_type=f32)

        def blur(m):
            """Separable Gaussian blur: (tb, h, w) -> (tb*out_wp, out_hp).

            bf16_3x emulation (drop only the lo*lo term) keeps ~f32 accuracy on
            the bf16-native MXU: 3 single-pass bf16 matmuls per stage instead of
            an emulated f32 (HIGHEST) matmul.
            """
            m_hi, m_lo = split(m)
            # Row blur (contract W):  r[n, i, k] = sum_j grow[i, j] * m[n, k, j]
            r = (bdot(grow_hi, m_hi) + bdot(grow_hi, m_lo)
                 + bdot(grow_lo, m_hi))                     # (tb, out_wp, h) f32
            r2 = r.reshape(tb * out_wp, h)                  # tile-aligned merge
            r_hi, r_lo = split(r2)
            # Column blur (contract H) as one big 2-D matmul, weight stationary.
            return (mdot(r_hi, gcol_hi) + mdot(r_hi, gcol_lo)
                    + mdot(r_lo, gcol_hi))                  # (tb*out_wp, out_hp)

        mu1 = blur(x1)
        mu2 = blur(x2)
        e11 = blur(x1 * x1)
        e22 = blur(x2 * x2)
        e12 = blur(x1 * x2)

        mu1_sq = mu1 * mu1
        mu2_sq = mu2 * mu2
        mu1_mu2 = mu1 * mu2
        sigma1_sq = e11 - mu1_sq
        sigma2_sq = e22 - mu2_sq
        sigma12 = e12 - mu1_mu2

        num = (2.0 * mu1_mu2 + _C1) * (2.0 * sigma12 + _C2)
        den = (mu1_sq + mu2_sq + _C1) * (sigma1_sq + sigma2_sq + _C2)
        # Accurate reciprocal keeps fake-pixel ssim == 1 exact-ish and moves the
        # divide onto the (otherwise idle) EUP slot.
        ssim_map = num * pl.reciprocal(den)

        # One lane-dense partial-sum block per grid step (no shared accumulator
        # -> grid axis stays "parallel"; the wrapper finishes the mean).
        psum = jnp.sum(ssim_map)
        out_ref[...] = jnp.full(out_ref.shape, psum, dtype=out_ref.dtype)

    return kernel


def ssim_pallas(img1, img2, window_size=WINDOW_SIZE, use_padding=True,
                size_average=True):
    """SSIM forward pass (matches pytorch_ssim.SSIM defaults). Inputs NCHW."""
    assert size_average, "only size_average=True (module default) implemented"
    # TODO(synk): size_average=False (per-image mean) variant not wired up.

    b, c, h, w = img1.shape
    pad = window_size // 2 if use_padding else 0
    out_h = h + 2 * pad - window_size + 1
    out_w = w + 2 * pad - window_size + 1
    assert out_h > 0 and out_w > 0

    # Pad conv-output dims up to sublane multiples with all-zero weight rows; the
    # fake pixels come out as exactly ssim == 1 and are subtracted below.
    out_hp = _round_up(out_h, 8)
    out_wp = _round_up(out_w, 16)   # 16 keeps the merged bf16 lhs tile-aligned
    # TODO(synk): also pad the lane dim (out_hp) up to 128 for fully unmasked
    # vector stores on large misaligned images (same ssim==1 correction applies).

    g = _gaussian_1d(window_size, SIGMA)
    grow = jnp.asarray(_conv_matrix(g, w, out_w, pad, out_wp))      # (out_wp, w)
    gcolt = jnp.asarray(_conv_matrix(g, h, out_h, pad, out_hp).T)   # (h, out_hp)
    grow_hi, grow_lo = _split_bf16_host(grow)
    gcolt_hi, gcolt_lo = _split_bf16_host(gcolt)

    n_slabs = b * c
    x1 = img1.reshape(n_slabs, h, w)     # no pad / no dtype cast of images in HBM
    x2 = img2.reshape(n_slabs, h, w)

    # ---- generation-aware tile sizing --------------------------------------
    try:
        vmem_cap = int(getattr(pltpu.get_tpu_info(), "vmem_capacity_bytes",
                               64 * 2 ** 20))
    except Exception:                    # conservative fallback
        vmem_cap = 64 * 2 ** 20
    # ~75% of physical VMEM: ~96 MiB on v5e/v6e (128 MiB/TC), ~48 MiB on v7x
    # (64 MiB/TC) -- headroom for Mosaic scratch & double-buffered blocks.
    vmem_limit = int(vmem_cap * 3 // 4)

    per_slab = 4 * (7 * h * w                 # in blocks (x2, dbl-buffered) + temps
                    + out_wp * w              # broadcast row-blur weights (hi+lo)
                    + 3 * out_wp * h          # row-blur intermediate + bf16 splits
                    + 10 * out_wp * out_hp)   # 5 blurred maps + elementwise temps
    const_bytes = 2 * (out_wp * w + h * out_hp) * 2 + 4 * 8 * 128 * 4
    budget = max(vmem_limit - const_bytes - (4 << 20), per_slab)
    tb = int(max(1, min(n_slabs, 256, budget // per_slab)))
    # Keep >= 2 grid steps so the "parallel" axis can shard across v7x's two
    # TensorCores (costs only one extra ~0.35us step on 1-TC chips).
    if n_slabs >= 2 and tb >= n_slabs:
        tb = -(-n_slabs // 2)
    n_groups = -(-n_slabs // tb)
    n_pad = n_groups * tb - n_slabs
    if n_pad:
        # Zero slabs yield ssim==1 per pixel; folded into the correction below.
        zpad = jnp.zeros((n_pad, h, w), x1.dtype)
        x1 = jnp.concatenate([x1, zpad], axis=0)
        x2 = jnp.concatenate([x2, zpad], axis=0)
    # TODO(synk): slabs whose single-image working set exceeds the per-core VMEM
    # budget (very large H*W, esp. on v7x) need H-strip tiling w/ a 10-row halo.

    kernel = _make_ssim_kernel(tb, h, w, out_hp, out_wp)

    partials = pl.pallas_call(
        kernel,
        out_shape=jax.ShapeDtypeStruct((n_groups, 8, 128), jnp.float32),
        grid=(n_groups,),
        in_specs=[
            pl.BlockSpec((tb, h, w), lambda i: (i, 0, 0)),
            pl.BlockSpec((tb, h, w), lambda i: (i, 0, 0)),
            pl.BlockSpec((out_wp, w), lambda i: (0, 0)),
            pl.BlockSpec((out_wp, w), lambda i: (0, 0)),
            pl.BlockSpec((h, out_hp), lambda i: (0, 0)),
            pl.BlockSpec((h, out_hp), lambda i: (0, 0)),
        ],
        out_specs=pl.BlockSpec((1, 8, 128), lambda i: (i, 0, 0)),
        compiler_params=pltpu.CompilerParams(
            dimension_semantics=("parallel",),
            vmem_limit_bytes=vmem_limit,
        ),
    )(x1, x2, grow_hi, grow_lo, gcolt_hi, gcolt_lo)

    total = jnp.sum(partials[:, 0, 0])
    # Every processed-but-fake pixel (zero-padded slabs + zero conv-matrix rows)
    # has mu = sigma = 0  =>  ssim == 1; subtract their exact count.
    processed = n_groups * tb * out_hp * out_wp
    real = n_slabs * out_h * out_w
    total = total - jnp.float32(processed - real)
    return total / jnp.float32(real)


def ssim_reference(img1, img2, window_size=WINDOW_SIZE, use_padding=True):
    """Pure-JAX reference reproducing torch F.conv2d(groups=C) semantics."""
    B, C, H, W = img1.shape
    g = _gaussian_1d(window_size, SIGMA)
    w2d = np.outer(g, g).astype(np.float32)
    window = jnp.asarray(np.tile(w2d[None, None], (C, 1, 1, 1)))  # (C,1,ws,ws)
    pad = window_size // 2 if use_padding else 0

    def conv(x):
        return lax.conv_general_dilated(
            x, window, window_strides=(1, 1),
            padding=[(pad, pad), (pad, pad)],
            feature_group_count=C,
            dimension_numbers=("NCHW", "OIHW", "NCHW"),
            precision=lax.Precision.HIGHEST)

    C1 = 0.01 ** 2
    C2 = 0.03 ** 2
    mu1 = conv(img1)
    mu2 = conv(img2)
    mu1_sq, mu2_sq, mu1_mu2 = mu1 * mu1, mu2 * mu2, mu1 * mu2
    sigma1_sq = conv(img1 * img1) - mu1_sq
    sigma2_sq = conv(img2 * img2) - mu2_sq
    sigma12 = conv(img1 * img2) - mu1_mu2
    ssim_map = ((2 * mu1_mu2 + C1) * (2 * sigma12 + C2)) / (
        (mu1_sq + mu2_sq + C1) * (sigma1_sq + sigma2_sq + C2))
    return ssim_map.mean()


if __name__ == "__main__":
    key = jax.random.PRNGKey(0)
    k1, k2 = jax.random.split(key)
    B, C, H, W = 2, 4, 16, 16
    img1 = jax.random.uniform(k1, (B, C, H, W), dtype=jnp.float32)
    img2 = jax.random.uniform(k2, (B, C, H, W), dtype=jnp.float32)

    out = jax.block_until_ready(ssim_pallas(img1, img2))
    ref = jax.block_until_ready(ssim_reference(img1, img2))
    # bf16_3x (hi/lo split) MXU emulation keeps the error far below 1e-4 vs the
    # f32 conv reference.
    assert np.allclose(np.asarray(out), np.asarray(ref), atol=1e-4), (out, ref)

    print("KERNEL_OK")
</pallas_src>

<mosaic_0001>
module attributes {stable_mosaic.version = 11 : i64} {
  func.func @kernel(%arg0: i32, %arg1: memref<4x16x16xf32, #tpu.memory_space<vmem>>, %arg2: memref<4x16x16xf32, #tpu.memory_space<vmem>>, %arg3: memref<16x16xbf16, #tpu.memory_space<vmem>>, %arg4: memref<16x16xbf16, #tpu.memory_space<vmem>>, %arg5: memref<16x16xbf16, #tpu.memory_space<vmem>>, %arg6: memref<16x16xbf16, #tpu.memory_space<vmem>>, %arg7: memref<1x8x128xf32, #tpu.memory_space<vmem>>) attributes {dimension_semantics = [#tpu.dimension_semantics<parallel>], iteration_bounds = array<i64: 2>, scalar_prefetch = 0 : i64, scratch_operands = 0 : i64, tpu.core_type = #tpu.core_type<tc>, window_params = [{transform_indices = @transform_0, window_bounds = array<i64: 4, 16, 16>}, {transform_indices = @transform_1, window_bounds = array<i64: 4, 16, 16>}, {pipeline_mode = #tpu.pipeline_mode<synchronous>, transform_indices = @transform_2, window_bounds = array<i64: 16, 16>}, {pipeline_mode = #tpu.pipeline_mode<synchronous>, transform_indices = @transform_3, window_bounds = array<i64: 16, 16>}, {pipeline_mode = #tpu.pipeline_mode<synchronous>, transform_indices = @transform_4, window_bounds = array<i64: 16, 16>}, {pipeline_mode = #tpu.pipeline_mode<synchronous>, transform_indices = @transform_5, window_bounds = array<i64: 16, 16>}, {transform_indices = @transform_6, window_bounds = array<i64: 1, 8, 128>}]} {
    %c0 = arith.constant 0 : index
    %c0_0 = arith.constant 0 : index
    %c0_1 = arith.constant 0 : index
    %0 = vector.load %arg1[%c0, %c0_0, %c0_1] : memref<4x16x16xf32, #tpu.memory_space<vmem>>, vector<4x16x16xf32>
    %c0_2 = arith.constant 0 : index
    %c0_3 = arith.constant 0 : index
    %c0_4 = arith.constant 0 : index
    %1 = vector.load %arg2[%c0_2, %c0_3, %c0_4] : memref<4x16x16xf32, #tpu.memory_space<vmem>>, vector<4x16x16xf32>
    %c0_5 = arith.constant 0 : index
    %c0_6 = arith.constant 0 : index
    %2 = vector.load %arg3[%c0_5, %c0_6] : memref<16x16xbf16, #tpu.memory_space<vmem>>, vector<16x16xbf16>
    %3 = vector.shape_cast %2 : vector<16x16xbf16> to vector<1x16x16xbf16>
    %4 = vector.broadcast %3 : vector<1x16x16xbf16> to vector<4x16x16xbf16>
    %c0_7 = arith.constant 0 : index
    %c0_8 = arith.constant 0 : index
    %5 = vector.load %arg4[%c0_7, %c0_8] : memref<16x16xbf16, #tpu.memory_space<vmem>>, vector<16x16xbf16>
    %6 = vector.shape_cast %5 : vector<16x16xbf16> to vector<1x16x16xbf16>
    %7 = vector.broadcast %6 : vector<1x16x16xbf16> to vector<4x16x16xbf16>
    %c0_9 = arith.constant 0 : index
    %c0_10 = arith.constant 0 : index
    %8 = vector.load %arg5[%c0_9, %c0_10] : memref<16x16xbf16, #tpu.memory_space<vmem>>, vector<16x16xbf16>
    %c0_11 = arith.constant 0 : index
    %c0_12 = arith.constant 0 : index
    %9 = vector.load %arg6[%c0_11, %c0_12] : memref<16x16xbf16, #tpu.memory_space<vmem>>, vector<16x16xbf16>
    %10 = arith.truncf %0 : vector<4x16x16xf32> to vector<4x16x16xbf16>
    %11 = arith.extf %10 : vector<4x16x16xbf16> to vector<4x16x16xf32>
    %12 = arith.subf %0, %11 : vector<4x16x16xf32>
    %13 = arith.truncf %12 : vector<4x16x16xf32> to vector<4x16x16xbf16>
    %cst = arith.constant dense<0.000000e+00> : vector<4x16x16xf32>
    %14 = tpu.matmul %4, %10, %cst {dimension_numbers = #tpu.dot_dimension_numbers<[2], [2], [1], [1], [0, 0, 0, 1, 1, 1], [0], [0]>} : vector<4x16x16xbf16>, vector<4x16x16xbf16>, vector<4x16x16xf32> -> vector<4x16x16xf32>
    %cst_13 = arith.constant dense<0.000000e+00> : vector<4x16x16xf32>
    %15 = tpu.matmul %4, %13, %cst_13 {dimension_numbers = #tpu.dot_dimension_numbers<[2], [2], [1], [1], [0, 0, 0, 1, 1, 1], [0], [0]>} : vector<4x16x16xbf16>, vector<4x16x16xbf16>, vector<4x16x16xf32> -> vector<4x16x16xf32>
    %16 = arith.addf %14, %15 : vector<4x16x16xf32>
    %cst_14 = arith.constant dense<0.000000e+00> : vector<4x16x16xf32>
    %17 = tpu.matmul %7, %10, %cst_14 {dimension_numbers = #tpu.dot_dimension_numbers<[2], [2], [1], [1], [0, 0, 0, 1, 1, 1], [0], [0]>} : vector<4x16x16xbf16>, vector<4x16x16xbf16>, vector<4x16x16xf32> -> vector<4x16x16xf32>
    %18 = arith.addf %16, %17 : vector<4x16x16xf32>
    %19 = vector.shape_cast %18 : vector<4x16x16xf32> to vector<64x16xf32>
    %20 = arith.truncf %19 : vector<64x16xf32> to vector<64x16xbf16>
    %21 = arith.extf %20 : vector<64x16xbf16> to vector<64x16xf32>
    %22 = arith.subf %19, %21 : vector<64x16xf32>
    %23 = arith.truncf %22 : vector<64x16xf32> to vector<64x16xbf16>
    %cst_15 = arith.constant dense<0.000000e+00> : vector<64x16xf32>
    %24 = tpu.matmul %20, %8, %cst_15 {dimension_numbers = #tpu.dot_dimension_numbers<[1], [0], [0], [1], [0, 0, 1, 1], [], []>} : vector<64x16xbf16>, vector<16x16xbf16>, vector<64x16xf32> -> vector<64x16xf32>
    %cst_16 = arith.constant dense<0.000000e+00> : vector<64x16xf32>
    %25 = tpu.matmul %20, %9, %cst_16 {dimension_numbers = #tpu.dot_dimension_numbers<[1], [0], [0], [1], [0, 0, 1, 1], [], []>} : vector<64x16xbf16>, vector<16x16xbf16>, vector<64x16xf32> -> vector<64x16xf32>
    %26 = arith.addf %24, %25 : vector<64x16xf32>
    %cst_17 = arith.constant dense<0.000000e+00> : vector<64x16xf32>
    %27 = tpu.matmul %23, %8, %cst_17 {dimension_numbers = #tpu.dot_dimension_numbers<[1], [0], [0], [1], [0, 0, 1, 1], [], []>} : vector<64x16xbf16>, vector<16x16xbf16>, vector<64x16xf32> -> vector<64x16xf32>
    %28 = arith.addf %26, %27 : vector<64x16xf32>
    %29 = arith.truncf %1 : vector<4x16x16xf32> to vector<4x16x16xbf16>
    %30 = arith.extf %29 : vector<4x16x16xbf16> to vector<4x16x16xf32>
    %31 = arith.subf %1, %30 : vector<4x16x16xf32>
    %32 = arith.truncf %31 : vector<4x16x16xf32> to vector<4x16x16xbf16>
    %cst_18 = arith.constant dense<0.000000e+00> : vector<4x16x16xf32>
    %33 = tpu.matmul %4, %29, %cst_18 {dimension_numbers = #tpu.dot_dimension_numbers<[2], [2], [1], [1], [0, 0, 0, 1, 1, 1], [0], [0]>} : vector<4x16x16xbf16>, vector<4x16x16xbf16>, vector<4x16x16xf32> -> vector<4x16x16xf32>
    %cst_19 = arith.constant dense<0.000000e+00> : vector<4x16x16xf32>
    %34 = tpu.matmul %4, %32, %cst_19 {dimension_numbers = #tpu.dot_dimension_numbers<[2], [2], [1], [1], [0, 0, 0, 1, 1, 1], [0], [0]>} : vector<4x16x16xbf16>, vector<4x16x16xbf16>, vector<4x16x16xf32> -> vector<4x16x16xf32>
    %35 = arith.addf %33, %34 : vector<4x16x16xf32>
    %cst_20 = arith.constant dense<0.000000e+00> : vector<4x16x16xf32>
    %36 = tpu.matmul %7, %29, %cst_20 {dimension_numbers = #tpu.dot_dimension_numbers<[2], [2], [1], [1], [0, 0, 0, 1, 1, 1], [0], [0]>} : vector<4x16x16xbf16>, vector<4x16x16xbf16>, vector<4x16x16xf32> -> vector<4x16x16xf32>
    %37 = arith.addf %35, %36 : vector<4x16x16xf32>
    %38 = vector.shape_cast %37 : vector<4x16x16xf32> to vector<64x16xf32>
    %39 = arith.truncf %38 : vector<64x16xf32> to vector<64x16xbf16>
    %40 = arith.extf %39 : vector<64x16xbf16> to vector<64x16xf32>
    %41 = arith.subf %38, %40 : vector<64x16xf32>
    %42 = arith.truncf %41 : vector<64x16xf32> to vector<64x16xbf16>
    %cst_21 = arith.constant dense<0.000000e+00> : vector<64x16xf32>
    %43 = tpu.matmul %39, %8, %cst_21 {dimension_numbers = #tpu.dot_dimension_numbers<[1], [0], [0], [1], [0, 0, 1, 1], [], []>} : vector<64x16xbf16>, vector<16x16xbf16>, vector<64x16xf32> -> vector<64x16xf32>
    %cst_22 = arith.constant dense<0.000000e+00> : vector<64x16xf32>
    %44 = tpu.matmul %39, %9, %cst_22 {dimension_numbers = #tpu.dot_dimension_numbers<[1], [0], [0], [1], [0, 0, 1, 1], [], []>} : vector<64x16xbf16>, vector<16x16xbf16>, vector<64x16xf32> -> vector<64x16xf32>
    %45 = arith.addf %43, %44 : vector<64x16xf32>
    %cst_23 = arith.constant dense<0.000000e+00> : vector<64x16xf32>
    %46 = tpu.matmul %42, %8, %cst_23 {dimension_numbers = #tpu.dot_dimension_numbers<[1], [0], [0], [1], [0, 0, 1, 1], [], []>} : vector<64x16xbf16>, vector<16x16xbf16>, vector<64x16xf32> -> vector<64x16xf32>
    %47 = arith.addf %45, %46 : vector<64x16xf32>
    %48 = arith.mulf %0, %0 : vector<4x16x16xf32>
    %49 = arith.truncf %48 : vector<4x16x16xf32> to vector<4x16x16xbf16>
    %50 = arith.extf %49 : vector<4x16x16xbf16> to vector<4x16x16xf32>
    %51 = arith.subf %48, %50 : vector<4x16x16xf32>
    %52 = arith.truncf %51 : vector<4x16x16xf32> to vector<4x16x16xbf16>
    %cst_24 = arith.constant dense<0.000000e+00> : vector<4x16x16xf32>
    %53 = tpu.matmul %4, %49, %cst_24 {dimension_numbers = #tpu.dot_dimension_numbers<[2], [2], [1], [1], [0, 0, 0, 1, 1, 1], [0], [0]>} : vector<4x16x16xbf16>, vector<4x16x16xbf16>, vector<4x16x16xf32> -> vector<4x16x16xf32>
    %cst_25 = arith.constant dense<0.000000e+00> : vector<4x16x16xf32>
    %54 = tpu.matmul %4, %52, %cst_25 {dimension_numbers = #tpu.dot_dimension_numbers<[2], [2], [1], [1], [0, 0, 0, 1, 1, 1], [0], [0]>} : vector<4x16x16xbf16>, vector<4x16x16xbf16>, vector<4x16x16xf32> -> vector<4x16x16xf32>
    %55 = arith.addf %53, %54 : vector<4x16x16xf32>
    %cst_26 = arith.constant dense<0.000000e+00> : vector<4x16x16xf32>
    %56 = tpu.matmul %7, %49, %cst_26 {dimension_numbers = #tpu.dot_dimension_numbers<[2], [2], [1], [1], [0, 0, 0, 1, 1, 1], [0], [0]>} : vector<4x16x16xbf16>, vector<4x16x16xbf16>, vector<4x16x16xf32> -> vector<4x16x16xf32>
    %57 = arith.addf %55, %56 : vector<4x16x16xf32>
    %58 = vector.shape_cast %57 : vector<4x16x16xf32> to vector<64x16xf32>
    %59 = arith.truncf %58 : vector<64x16xf32> to vector<64x16xbf16>
    %60 = arith.extf %59 : vector<64x16xbf16> to vector<64x16xf32>
    %61 = arith.subf %58, %60 : vector<64x16xf32>
    %62 = arith.truncf %61 : vector<64x16xf32> to vector<64x16xbf16>
    %cst_27 = arith.constant dense<0.000000e+00> : vector<64x16xf32>
    %63 = tpu.matmul %59, %8, %cst_27 {dimension_numbers = #tpu.dot_dimension_numbers<[1], [0], [0], [1], [0, 0, 1, 1], [], []>} : vector<64x16xbf16>, vector<16x16xbf16>, vector<64x16xf32> -> vector<64x16xf32>
    %cst_28 = arith.constant dense<0.000000e+00> : vector<64x16xf32>
    %64 = tpu.matmul %59, %9, %cst_28 {dimension_numbers = #tpu.dot_dimension_numbers<[1], [0], [0], [1], [0, 0, 1, 1], [], []>} : vector<64x16xbf16>, vector<16x16xbf16>, vector<64x16xf32> -> vector<64x16xf32>
    %65 = arith.addf %63, %64 : vector<64x16xf32>
    %cst_29 = arith.constant dense<0.000000e+00> : vector<64x16xf32>
    %66 = tpu.matmul %62, %8, %cst_29 {dimension_numbers = #tpu.dot_dimension_numbers<[1], [0], [0], [1], [0, 0, 1, 1], [], []>} : vector<64x16xbf16>, vector<16x16xbf16>, vector<64x16xf32> -> vector<64x16xf32>
    %67 = arith.addf %65, %66 : vector<64x16xf32>
    %68 = arith.mulf %1, %1 : vector<4x16x16xf32>
    %69 = arith.truncf %68 : vector<4x16x16xf32> to vector<4x16x16xbf16>
    %70 = arith.extf %69 : vector<4x16x16xbf16> to vector<4x16x16xf32>
    %71 = arith.subf %68, %70 : vector<4x16x16xf32>
    %72 = arith.truncf %71 : vector<4x16x16xf32> to vector<4x16x16xbf16>
    %cst_30 = arith.constant dense<0.000000e+00> : vector<4x16x16xf32>
    %73 = tpu.matmul %4, %69, %cst_30 {dimension_numbers = #tpu.dot_dimension_numbers<[2], [2], [1], [1], [0, 0, 0, 1, 1, 1], [0], [0]>} : vector<4x16x16xbf16>, vector<4x16x16xbf16>, vector<4x16x16xf32> -> vector<4x16x16xf32>
    %cst_31 = arith.constant dense<0.000000e+00> : vector<4x16x16xf32>
    %74 = tpu.matmul %4, %72, %cst_31 {dimension_numbers = #tpu.dot_dimension_numbers<[2], [2], [1], [1], [0, 0, 0, 1, 1, 1], [0], [0]>} : vector<4x16x16xbf16>, vector<4x16x16xbf16>, vector<4x16x16xf32> -> vector<4x16x16xf32>
    %75 = arith.addf %73, %74 : vector<4x16x16xf32>
    %cst_32 = arith.constant dense<0.000000e+00> : vector<4x16x16xf32>
    %76 = tpu.matmul %7, %69, %cst_32 {dimension_numbers = #tpu.dot_dimension_numbers<[2], [2], [1], [1], [0, 0, 0, 1, 1, 1], [0], [0]>} : vector<4x16x16xbf16>, vector<4x16x16xbf16>, vector<4x16x16xf32> -> vector<4x16x16xf32>
    %77 = arith.addf %75, %76 : vector<4x16x16xf32>
    %78 = vector.shape_cast %77 : vector<4x16x16xf32> to vector<64x16xf32>
    %79 = arith.truncf %78 : vector<64x16xf32> to vector<64x16xbf16>
    %80 = arith.extf %79 : vector<64x16xbf16> to vector<64x16xf32>
    %81 = arith.subf %78, %80 : vector<64x16xf32>
    %82 = arith.truncf %81 : vector<64x16xf32> to vector<64x16xbf16>
    %cst_33 = arith.constant dense<0.000000e+00> : vector<64x16xf32>
    %83 = tpu.matmul %79, %8, %cst_33 {dimension_numbers = #tpu.dot_dimension_numbers<[1], [0], [0], [1], [0, 0, 1, 1], [], []>} : vector<64x16xbf16>, vector<16x16xbf16>, vector<64x16xf32> -> vector<64x16xf32>
    %cst_34 = arith.constant dense<0.000000e+00> : vector<64x16xf32>
    %84 = tpu.matmul %79, %9, %cst_34 {dimension_numbers = #tpu.dot_dimension_numbers<[1], [0], [0], [1], [0, 0, 1, 1], [], []>} : vector<64x16xbf16>, vector<16x16xbf16>, vector<64x16xf32> -> vector<64x16xf32>
    %85 = arith.addf %83, %84 : vector<64x16xf32>
    %cst_35 = arith.constant dense<0.000000e+00> : vector<64x16xf32>
    %86 = tpu.matmul %82, %8, %cst_35 {dimension_numbers = #tpu.dot_dimension_numbers<[1], [0], [0], [1], [0, 0, 1, 1], [], []>} : vector<64x16xbf16>, vector<16x16xbf16>, vector<64x16xf32> -> vector<64x16xf32>
    %87 = arith.addf %85, %86 : vector<64x16xf32>
    %88 = arith.mulf %0, %1 : vector<4x16x16xf32>
    %89 = arith.truncf %88 : vector<4x16x16xf32> to vector<4x16x16xbf16>
    %90 = arith.extf %89 : vector<4x16x16xbf16> to vector<4x16x16xf32>
    %91 = arith.subf %88, %90 : vector<4x16x16xf32>
    %92 = arith.truncf %91 : vector<4x16x16xf32> to vector<4x16x16xbf16>
    %cst_36 = arith.constant dense<0.000000e+00> : vector<4x16x16xf32>
    %93 = tpu.matmul %4, %89, %cst_36 {dimension_numbers = #tpu.dot_dimension_numbers<[2], [2], [1], [1], [0, 0, 0, 1, 1, 1], [0], [0]>} : vector<4x16x16xbf16>, vector<4x16x16xbf16>, vector<4x16x16xf32> -> vector<4x16x16xf32>
    %cst_37 = arith.constant dense<0.000000e+00> : vector<4x16x16xf32>
    %94 = tpu.matmul %4, %92, %cst_37 {dimension_numbers = #tpu.dot_dimension_numbers<[2], [2], [1], [1], [0, 0, 0, 1, 1, 1], [0], [0]>} : vector<4x16x16xbf16>, vector<4x16x16xbf16>, vector<4x16x16xf32> -> vector<4x16x16xf32>
    %95 = arith.addf %93, %94 : vector<4x16x16xf32>
    %cst_38 = arith.constant dense<0.000000e+00> : vector<4x16x16xf32>
    %96 = tpu.matmul %7, %89, %cst_38 {dimension_numbers = #tpu.dot_dimension_numbers<[2], [2], [1], [1], [0, 0, 0, 1, 1, 1], [0], [0]>} : vector<4x16x16xbf16>, vector<4x16x16xbf16>, vector<4x16x16xf32> -> vector<4x16x16xf32>
    %97 = arith.addf %95, %96 : vector<4x16x16xf32>
    %98 = vector.shape_cast %97 : vector<4x16x16xf32> to vector<64x16xf32>
    %99 = arith.truncf %98 : vector<64x16xf32> to vector<64x16xbf16>
    %100 = arith.extf %99 : vector<64x16xbf16> to vector<64x16xf32>
    %101 = arith.subf %98, %100 : vector<64x16xf32>
    %102 = arith.truncf %101 : vector<64x16xf32> to vector<64x16xbf16>
    %cst_39 = arith.constant dense<0.000000e+00> : vector<64x16xf32>
    %103 = tpu.matmul %99, %8, %cst_39 {dimension_numbers = #tpu.dot_dimension_numbers<[1], [0], [0], [1], [0, 0, 1, 1], [], []>} : vector<64x16xbf16>, vector<16x16xbf16>, vector<64x16xf32> -> vector<64x16xf32>
    %cst_40 = arith.constant dense<0.000000e+00> : vector<64x16xf32>
    %104 = tpu.matmul %99, %9, %cst_40 {dimension_numbers = #tpu.dot_dimension_numbers<[1], [0], [0], [1], [0, 0, 1, 1], [], []>} : vector<64x16xbf16>, vector<16x16xbf16>, vector<64x16xf32> -> vector<64x16xf32>
    %105 = arith.addf %103, %104 : vector<64x16xf32>
    %cst_41 = arith.constant dense<0.000000e+00> : vector<64x16xf32>
    %106 = tpu.matmul %102, %8, %cst_41 {dimension_numbers = #tpu.dot_dimension_numbers<[1], [0], [0], [1], [0, 0, 1, 1], [], []>} : vector<64x16xbf16>, vector<16x16xbf16>, vector<64x16xf32> -> vector<64x16xf32>
    %107 = arith.addf %105, %106 : vector<64x16xf32>
    %108 = arith.mulf %28, %28 : vector<64x16xf32>
    %109 = arith.mulf %47, %47 : vector<64x16xf32>
    %110 = arith.mulf %28, %47 : vector<64x16xf32>
    %111 = arith.subf %67, %108 : vector<64x16xf32>
    %112 = arith.subf %87, %109 : vector<64x16xf32>
    %113 = arith.subf %107, %110 : vector<64x16xf32>
    %cst_42 = arith.constant 2.000000e+00 : f32
    %114 = vector.broadcast %cst_42 : f32 to vector<64x16xf32>
    %115 = arith.mulf %114, %110 : vector<64x16xf32>
    %cst_43 = arith.constant 9.99999974E-5 : f32
    %116 = vector.broadcast %cst_43 : f32 to vector<64x16xf32>
    %117 = arith.addf %115, %116 : vector<64x16xf32>
    %cst_44 = arith.constant 2.000000e+00 : f32
    %118 = vector.broadcast %cst_44 : f32 to vector<64x16xf32>
    %119 = arith.mulf %118, %113 : vector<64x16xf32>
    %cst_45 = arith.constant 8.99999984E-4 : f32
    %120 = vector.broadcast %cst_45 : f32 to vector<64x16xf32>
    %121 = arith.addf %119, %120 : vector<64x16xf32>
    %122 = arith.mulf %117, %121 : vector<64x16xf32>
    %123 = arith.addf %108, %109 : vector<64x16xf32>
    %cst_46 = arith.constant 9.99999974E-5 : f32
    %124 = vector.broadcast %cst_46 : f32 to vector<64x16xf32>
    %125 = arith.addf %123, %124 : vector<64x16xf32>
    %126 = arith.addf %111, %112 : vector<64x16xf32>
    %cst_47 = arith.constant 8.99999984E-4 : f32
    %127 = vector.broadcast %cst_47 : f32 to vector<64x16xf32>
    %128 = arith.addf %126, %127 : vector<64x16xf32>
    %129 = arith.mulf %125, %128 : vector<64x16xf32>
    %130 = tpu.reciprocal %129 : vector<64x16xf32> -> vector<64x16xf32>
    %131 = arith.mulf %122, %130 : vector<64x16xf32>
    %132 = vector.shape_cast %131 : vector<64x16xf32> to vector<1x64x16xf32>
    %cst_48 = arith.constant dense<0.000000e+00> : vector<1xf32>
    %133 = vector.multi_reduction <add>, %132, %cst_48 [1, 2] : vector<1x64x16xf32> to vector<1xf32>
    %134 = vector.shape_cast %133 : vector<1xf32> to vector<1x1x1xf32>
    %135 = vector.extract %134[0, 0, 0] : f32 from vector<1x1x1xf32>
    %136 = vector.broadcast %135 : f32 to vector<1x8x128xf32>
    %c0_49 = arith.constant 0 : index
    %c0_50 = arith.constant 0 : index
    %c0_51 = arith.constant 0 : index
    %137 = vector.load %arg7[%c0_49, %c0_50, %c0_51] : memref<1x8x128xf32, #tpu.memory_space<vmem>>, vector<1x8x128xf32>
    tpu.vector_store %arg7[%c0_49, %c0_50, %c0_51], %136 {strides = array<i32>} : memref<1x8x128xf32, #tpu.memory_space<vmem>>, vector<1x8x128xf32>,
    return
  }
  func.func @transform_0(%arg0: i32) -> (i32, i32, i32) {
    %c0_i32 = arith.constant 0 : i32
    %c0_i32_0 = arith.constant 0 : i32
    %c0_i32_1 = arith.constant 0 : i32
    return %arg0, %c0_i32, %c0_i32_0 : i32, i32, i32
  }
  func.func @transform_1(%arg0: i32) -> (i32, i32, i32) {
    %c0_i32 = arith.constant 0 : i32
    %c0_i32_0 = arith.constant 0 : i32
    %c0_i32_1 = arith.constant 0 : i32
    return %arg0, %c0_i32, %c0_i32_0 : i32, i32, i32
  }
  func.func @transform_2(%arg0: i32) -> (i32, i32) {
    %c0_i32 = arith.constant 0 : i32
    %c0_i32_0 = arith.constant 0 : i32
    %c0_i32_1 = arith.constant 0 : i32
    return %c0_i32, %c0_i32_0 : i32, i32
  }
  func.func @transform_3(%arg0: i32) -> (i32, i32) {
    %c0_i32 = arith.constant 0 : i32
    %c0_i32_0 = arith.constant 0 : i32
    %c0_i32_1 = arith.constant 0 : i32
    return %c0_i32, %c0_i32_0 : i32, i32
  }
  func.func @transform_4(%arg0: i32) -> (i32, i32) {
    %c0_i32 = arith.constant 0 : i32
    %c0_i32_0 = arith.constant 0 : i32
    %c0_i32_1 = arith.constant 0 : i32
    return %c0_i32, %c0_i32_0 : i32, i32
  }
  func.func @transform_5(%arg0: i32) -> (i32, i32) {
    %c0_i32 = arith.constant 0 : i32
    %c0_i32_0 = arith.constant 0 : i32
    %c0_i32_1 = arith.constant 0 : i32
    return %c0_i32, %c0_i32_0 : i32, i32
  }
  func.func @transform_6(%arg0: i32) -> (i32, i32, i32) {
    %c0_i32 = arith.constant 0 : i32
    %c0_i32_0 = arith.constant 0 : i32
    %c0_i32_1 = arith.constant 0 : i32
    return %arg0, %c0_i32, %c0_i32_0 : i32, i32, i32
  }
}

</mosaic_0001>

<bundles_post_ra>
// kernel: tpu_custom_call.1
= control target key start
LH: loop header
LB: loop body
LE: loop exit
PB: predicated region body
PF: predicated region fallthrough
CT: control target
= control target key end

     0   :  { %s7366_s0 = inlined_call_operand.hbm [shape: f32[8,16,16], index: 0, kind: input, shape index: {}]   ;;  %s7367_s1 = inlined_call_operand.hbm [shape: f32[8,16,16], index: 1, kind: input, shape index: {}]   ;;  %s7368_s2 = inlined_call_operand.hbm [shape: bf16[16,16], index: 2, kind: input, shape index: {}]   ;;  %s7369_s3 = inlined_call_operand.vmem [shape: bf16[16,16], index: 3, kind: input, shape index: {}]   ;;  %s7370_s4 = inlined_call_operand.hbm [shape: bf16[16,16], index: 4, kind: input, shape index: {}]   ;;  %s7371_s5 = inlined_call_operand.vmem [shape: bf16[16,16], index: 5, kind: input, shape index: {}]   ;;  %s7372_s6 = inlined_call_operand.hbm [shape: f32[2,8,128], index: 6, kind: output, shape index: {}]  }
   0x1   :  { %7382 = sst [smem:[#allocation20_spill]] %s7366_s0 }
   0x2   :  { %7383 = sst [smem:[#allocation21_spill]] %s7368_s2 }
   0x3   :  { %7384 = sst [smem:[#allocation22_spill]] %s7370_s4 }
   0x4   :  { %11 = vsyncpa [#allocation3], 0 }
   0x5   :  { %13 = vsyncpa [#allocation3 + $0x1], 0 }
   0x6   :  { %14 = vsyncpa [#allocation6], 0 }
   0x7   :  { %16 = vsyncpa [#allocation6 + $0x1], 0 }
   0x8   :  { %17 = vsyncpa [#allocation9], 0 }
   0x9   :  { %18 = vsyncpa [#allocation4], 0 }
   0xa   :  { %20 = vsyncpa [#allocation4 + $0x1], 0  ;;  %s6164_s21 = smov 0   ;;  %s6166_s22 = smov 0  }
   0xb   :  { %s6168_s23 = smov 0   ;;  %s6170_s24 = smov 0  }
   0xc LB: > { %s6185_s25 = sadd.s32 4294967295, %s6116_s24   ;;  %s4712_s26 = sadd.s32 4294967294, %s6116_s24   ;;  %s6116_s24 = sphi %s6170_s24, %s7421_s24   ;;  %s6112_s23 = sphi %s6168_s23, %s7420_s23   ;;  %s6108_s22 = sphi %s6166_s22, %s7419_s22   ;;  %s6104_s21 = sphi %s6164_s21, %s7418_s21  }
   0xd   : > { %p46_p0 = scmp.ne.s32.totalorder %s6108_s22, %s6104_s21  ;;  %p7373_p1 = scmp.eq.s32.totalorder %s6185_s25, 0 }
   0xe   : > { %p186_p3 = scmp.eq.s32.totalorder %s4712_s26, 1  ;;  %p4713_p5 = scmp.ge.s32.totalorder %s6116_s24, 1 }
   0xf   : > { %p6194_p4 = por %p7373_p1, %p46_p0  ;;  %p193_p7 = scmp.lt.s32.totalorder %s6116_s24, 3 }
  0x10   : > { %p6199_p6 = por %p186_p3, %p46_p0  ;;  %s6118_s30 = smov [#allocation7]  }
  0x11   : > { %s7385_s27 = scalar_select %p6194_p4, 1, 0 }
  0x12   : > { %s7386_s28 = scalar_select %p6199_p6, 1, 0 }
  0x13   : > { %p6204_p8 = pnand %p4713_p5, %p193_p7  ;;  %s205_s7 = sshll.u32 %s6118_s30, 4  ;;  %s6208_s7 = int_to_ptr.vmem [resolvable:$true] %s205_s7 }
  0x14   : > { %s6119_s9 = smov [#allocation8]   ;;  %s7389_s2 = sld [smem:[#allocation21_spill]] }
  0x15   : > { %p5822_p9 = pneg %p6204_p8  ;;  %s221_s10 = sshll.u32 %s6119_s9, 4  ;;  %s6219_s10 = int_to_ptr.vmem [resolvable:$true] %s221_s10 }
  0x17   : > { %p6215_p11 = pnand %p5822_p9, %p7373_p1 }
  0x19   : > { %p5924_p13 = pneg %p6215_p11 }
  0x1a   : > { %s5922_s13 = scalar_lea.hbm %s7389_s2, 128 }
  0x1b   : > { %p5923_p12 = scmp.ne.s32.totalorder %s7389_s2, %s5922_s13  ;;  %p5929_p5 = scmp.lt.u32.totalorder %s5922_s13, %s7389_s2 }
  0x1d   : > { %p5925_p0 = pnand %p5924_p13, %p5923_p12 }
  0x1f   : > { %p5926_p3 = pneg %p5925_p0 }
  0x21   : > { %p5931_p7 = pnand %p5929_p5, %p5926_p3 }
  0x23   : > { %5934 = shalt.err (!%p5931_p7)
}
  0x24   : > { %s5935_s18 = scalar_lea.vmem %s6208_s7, 128  ;;  %p5943_p2 = scmp.lt.s32.totalorder %s6208_s7, %s6208_s7 }
  0x25   : > { %p5936_p9 = scmp.ne.s32.totalorder %s6208_s7, %s5935_s18  ;;  %p5944_p12 = scmp.lt.s32.totalorder %s5935_s18, %s5935_s18 }
  0x27   : > { %p5938_p10 = pnand %p5936_p9, %p5924_p13  ;;  %p5945_p0 = por %p5944_p12, %p5943_p2 }
  0x29   : > { %p5939_p1 = pneg %p5938_p10 }
  0x2b   : > { %p5946_p6 = pnand %p5945_p0, %p5939_p1 }
  0x2d   : > { %5949 = shalt.err (!%p5946_p6)
}
  0x2e   : > { %s6120_s19 = smov 64   ;;  %s6121_s20 = smov 4  }
  0x2f   : > { %5825 = dma.hbm_to_vmem [thread:$0]  (!%p6215_p11), %s7389_s2, 128, %s6208_s7, [#allocation6], %s6120_s19, %s6120_s19, %s6121_s20  }
  0x30   : > { %s7390_s4 = sld [smem:[#allocation22_spill]] }
  0x36   : > { %s5950_s12 = scalar_lea.hbm %s7390_s4, 128 }
  0x37   : > { %p5951_p2 = scmp.ne.s32.totalorder %s7390_s4, %s5950_s12  ;;  %p5957_p10 = scmp.lt.u32.totalorder %s5950_s12, %s7390_s4 }
  0x39   : > { %p5953_p1 = pnand %p5951_p2, %p5924_p13 }
  0x3b   : > { %p5954_p6 = pneg %p5953_p1 }
  0x3d   : > { %p5959_p3 = pnand %p5957_p10, %p5954_p6 }
  0x3f   : > { %5962 = shalt.err (!%p5959_p3)
}
  0x40   : > { %s5963_s7 = scalar_lea.vmem %s6219_s10, 128  ;;  %p5971_p12 = scmp.lt.s32.totalorder %s6219_s10, %s6219_s10 }
  0x41   : > { %p5964_p5 = scmp.ne.s32.totalorder %s6219_s10, %s5963_s7  ;;  %p5972_p0 = scmp.lt.s32.totalorder %s5963_s7, %s5963_s7 }
  0x43   : > { %p5966_p7 = pnand %p5964_p5, %p5924_p13  ;;  %p5973_p2 = por %p5972_p0, %p5971_p12 }
  0x45   : > { %p5967_p9 = pneg %p5966_p7 }
  0x47   : > { %p5974_p1 = pnand %p5973_p2, %p5967_p9 }
  0x49   : > { %5977 = shalt.err (!%p5974_p1)
}
  0x4a   : > { %5828 = dma.hbm_to_vmem [thread:$0]  (!%p6215_p11), %s7390_s4, 128, %s6219_s10, [#allocation9], %s6120_s19, %s6120_s19, %s6121_s20  }
  0x4b   : > { %s6274_s26 = sadd.s32 1, %s6116_s24   ;;  %s33_s8 = sadd.s32 1, %s6112_s23 }
  0x4c   : > { %s30_s30 = ssub.s32 %s6116_s24, %s6274_s26  ;;  %p40_p13 = scmp.ne.s32.totalorder %s6112_s23, %s6108_s22 }
  0x4d   : > { %p31_p6 = scmp.eq.s32.totalorder %s30_s30, 0  ;;  %p41_p10 = scmp.eq.s32.totalorder %s6116_s24, 0 }
  0x4e   : > { %p7391_p3 = scmp.eq.s32.totalorder %s6185_s25, 1  ;;  %p5842_p7 = scmp.lt.s32.totalorder %s6116_s24, 2 }
  0x4f   : > { %s6290_s11 = scalar_select %p31_p6, %s6112_s23, %s33_s8  }
  0x50   : > { %p6284_p5 = por %p7391_p3, %p40_p13  ;;  %p42_p9 = por %p41_p10, %p40_p13 }
  0x51   : > { %s238_s12 = sand.u32 1, %s6112_s23   ;;  %s4860_s10 = sshll.u32 %s6116_s24, 10 }
  0x52   : > { %s7392_s9 = scalar_select %p6284_p5, 1, 0 }
  0x53   : > { %s6293_s13 = sshll.u32 %s238_s12, 6  ;;  %s7393_s0 = sld [smem:[#allocation20_spill]] }
  0x54   : > { %s242_s15 = scalar_lea.vmem [#allocation2], %s6293_s13  ;;  %p6306_p11 = pnand %p5842_p7, %p42_p9 }
  0x55   : > { %s250_s16 = sshll.u32 %s242_s15, 4  ;;  %s6310_s17 = scalar_lea.sflag [#allocation3], %s238_s12  ;;  %s6304_s16 = int_to_ptr.vmem [resolvable:$true] %s250_s16 }
  0x56   : > { %p5980_p0 = pneg %p6306_p11 }
  0x59   : > { %s6301_s14 = scalar_lea.hbm %s7393_s0, %s4860_s10  ;;  %s5983_s19 = scalar_lea.hbm %s7393_s0, 2048 }
  0x5a   : > { %s5978_s18 = scalar_lea.hbm %s6301_s14, 1024  ;;  %p5984_p13 = scmp.lt.u32.totalorder %s6301_s14, %s7393_s0 }
  0x5b   : > { %p5979_p12 = scmp.ne.s32.totalorder %s6301_s14, %s5978_s18  ;;  %p5985_p6 = scmp.lt.u32.totalorder %s5983_s19, %s5978_s18 }
  0x5c   : > { %p5987_p3 = scmp.lt.u32.totalorder %s5978_s18, %s6301_s14 }
  0x5d   : > { %p5981_p2 = pnand %p5980_p0, %p5979_p12  ;;  %p5986_p10 = por %p5985_p6, %p5984_p13 }
  0x5f   : > { %p5982_p1 = pneg %p5981_p2  ;;  %p5988_p7 = por %p5987_p3, %p5986_p10 }
  0x61   : > { %p5989_p9 = pnand %p5988_p7, %p5982_p1 }
  0x63   : > { %5992 = shalt.err (!%p5989_p9)
}
  0x64   : > { %s5993_s12 = scalar_lea.vmem %s6304_s16, 1024  ;;  %s6122_s8 = smov [#allocation2]  }
  0x65   : > { %p5994_p12 = scmp.ne.s32.totalorder %s6304_s16, %s5993_s12  ;;  %s5998_s30 = sshll.u32 %s6122_s8, 4  ;;  %s5999_s30 = int_to_ptr.vmem [resolvable:$false] %s5998_s30 }
  0x66   : > { %s6000_s20 = scalar_lea.vmem %s5999_s30, 2048  ;;  %p6001_p4 = scmp.lt.s32.totalorder %s6304_s16, %s5999_s30 }
  0x67   : > { %p5996_p2 = pnand %p5994_p12, %p5980_p0  ;;  %p6002_p13 = scmp.lt.s32.totalorder %s6000_s20, %s5993_s12 }
  0x69   : > { %p5997_p5 = pneg %p5996_p2  ;;  %p6003_p6 = por %p6002_p13, %p6001_p4 }
  0x6b   : > { %p6004_p10 = pnand %p6003_p6, %p5997_p5 }
  0x6d   : > { %6007 = shalt.err (!%p6004_p10)
}
  0x6e   : > { %s6123_s18 = smov 128   ;;  %s6124_s19 = smov 8  }
  0x6f   : > { %5832 = dma.hbm_to_vmem [thread:$0]  (!%p6306_p11), %s6301_s14, 1024, %s6304_s16, %s6310_s17, %s6123_s18, %s6123_s18, %s6124_s19  }
  0x70   : > { %s6346_s8 = scalar_lea.hbm %s7367_s1, %s4860_s10  ;;  %s264_s30 = scalar_lea.vmem [#allocation5], %s6293_s13 }
  0x71   : > { %s272_s20 = sshll.u32 %s264_s30, 4  ;;  %s260_s0 = sand.u32 1, %s6116_s24   ;;  %s6349_s20 = int_to_ptr.vmem [resolvable:$true] %s272_s20 }
  0x72   : > { %s6352_s2 = scalar_lea.sflag [#allocation6], %s260_s0  ;;  %s6008_s4 = scalar_lea.hbm %s6346_s8, 1024 }
  0x73   : > { %p6009_p4 = scmp.ne.s32.totalorder %s6346_s8, %s6008_s4  ;;  %s6013_s16 = scalar_lea.hbm %s7367_s1, 2048 }
  0x74   : > { %p6014_p3 = scmp.lt.u32.totalorder %s6346_s8, %s7367_s1  ;;  %p6015_p7 = scmp.lt.u32.totalorder %s6013_s16, %s6008_s4 }
  0x75   : > { %p6011_p5 = pnand %p6009_p4, %p5980_p0  ;;  %p6017_p12 = scmp.lt.u32.totalorder %s6008_s4, %s6346_s8 }
  0x76   : > { %p6016_p9 = por %p6015_p7, %p6014_p3 }
  0x77   : > { %p6012_p1 = pneg %p6011_p5 }
  0x78   : > { %p6018_p2 = por %p6017_p12, %p6016_p9 }
  0x7a   : > { %p6019_p13 = pnand %p6018_p2, %p6012_p1 }
  0x7c   : > { %6022 = shalt.err (!%p6019_p13)
}
  0x7d   : > { %s6023_s0 = scalar_lea.vmem %s6349_s20, 1024  ;;  %s6125_s13 = smov [#allocation5]  }
  0x7e   : > { %p6024_p6 = scmp.ne.s32.totalorder %s6349_s20, %s6023_s0  ;;  %s6028_s12 = sshll.u32 %s6125_s13, 4  ;;  %s6029_s12 = int_to_ptr.vmem [resolvable:$false] %s6028_s12 }
  0x7f   : > { %s6030_s30 = scalar_lea.vmem %s6029_s12, 2048  ;;  %p6031_p5 = scmp.lt.s32.totalorder %s6349_s20, %s6029_s12 }
  0x80   : > { %p6026_p10 = pnand %p6024_p6, %p5980_p0  ;;  %p6032_p3 = scmp.lt.s32.totalorder %s6030_s30, %s6023_s0 }
  0x82   : > { %p6027_p4 = pneg %p6026_p10  ;;  %p6033_p7 = por %p6032_p3, %p6031_p5 }
  0x84   : > { %p6034_p9 = pnand %p6033_p7, %p6027_p4 }
  0x86   : > { %6037 = shalt.err (!%p6034_p9)
}
  0x87   : > { %5835 = dma.hbm_to_vmem [thread:$0]  (!%p6306_p11), %s6346_s8, 1024, %s6349_s20, %s6352_s2, %s6123_s18, %s6123_s18, %s6124_s19  }
  0x88   : > { %284 = sbr.rel (%p6204_p8) target bundleno = 1874 (0x752), region = 44 }
  0x8f   : > { %s6384_s4 = sand.u32 1, %s6108_s22   ;;  %p7395_p0 = scmp.ne.s32.totalorder %s7385_s27, 0 }
  0x90   : > { %s4726_s14 = sshll.u32 %s6384_s4, 6  ;;  %s287_s10 = scalar_lea.sflag [#allocation3], %s6384_s4 }
  0x91   : > { %s6388_s16 = scalar_lea.vmem [#allocation2], %s4726_s14 }
  0x92   : > { %6083 = dma.done.wait (%p7395_p0), %s287_s10, 1024  }
  0x93   : > { %6085 = vsyncadd (%p7395_p0), %s287_s10, 4294966272  ;;  %s295_s2 = sand.u32 1, %s6185_s25   ;;  %s6395_s7 = scalar_lea.vmem [#allocation5], %s4726_s14 }
  0x94   : > { %s296_s29 = scalar_lea.sflag [#allocation6], %s295_s2 }
  0x95   : > { %6087 = dma.done.wait (%p7395_p0), %s296_s29, 1024  }
  0x96   : > { %6089 = vsyncadd (%p7395_p0), %s296_s29, 4294966272  ;;  %p7396_p8 = scmp.eq.s32.totalorder %s6185_s25, 0 }
  0x98   : > { %6091 = dma.done.wait (%p7396_p8), [#allocation6], 128   ;;  %p7397_p11 = pmov %p7396_p8 }
  0x99   : > { %p7398_p1 = pmov %p7396_p8 }
  0x9a   : > { %6093 = vsyncadd (%p7397_p11), [#allocation6], 4294967168 }
  0x9b   : > { %6095 = dma.done.wait (%p7398_p1), [#allocation9], 128   ;;  %p7399_p12 = pmov %p7398_p1 }
  0x9c   : > { %v7376_v0 = vmov 0.0   ;;  %vm6127_vm0 = vmmov 0   ;;  %v6416_v1 = vld [vmem:[%s6388_s16] sm:$0xff]  ;;  %v6419_v2 = vld [vmem:[%s6388_s16 + $0x8] sm:$0xff]  ;;  %v6432_v7 = vld [vmem:[%s6388_s16 + $0x10] sm:$0xff]  ;;  %vm397_vm1 = vcmask 130048  }
  0x9d   : > { %6097 = vsyncadd (%p7399_p12), [#allocation9], 4294967168  ;;  %5058 = vmatprep.subr.bf16.mxu1 %v7376_v0  ;;  %5070 = vmatprep.subr.bf16.mxu0 %v7376_v0  ;;  %v6422_v3 = vld [vmem:[%s6388_s16 + $0x20] sm:$0xff]  ;;  %v368_v4 = vpack.c.bf16 %v6419_v2, %v6416_v1  ;;  %v6427_v5 = vld [vmem:[%s6388_s16 + $0x28] sm:$0xff]  ;;  %s4730_s13 = sshll.u32 %s6384_s4, 3  ;;  %s4856_s14 = sshll.u32 %s6185_s25, 7 }
  0x9e   : > { %5060 = vmatprep.mubr.msk.bf16.mxu1 %vm6127_vm0, %v7376_v0  ;;  %5072 = vmatprep.mubr.msk.bf16.mxu0 %vm6127_vm0, %v7376_v0  ;;  %v370_v6 = vpack.c.bf16 %v6427_v5, %v6422_v3  ;;  %v6435_v8 = vld [vmem:[%s6388_s16 + $0x18] sm:$0xff]  ;;  %v6440_v12 = vld [vmem:[%s6388_s16 + $0x30] sm:$0xff]  ;;  %v6457_v32 = vld [vmem:[#allocation7] sm:$0xff]   ;;  %s340_s12 = scalar_lea.vmem [#allocation10], %s4730_s13  ;;  %s7324_s29 = scalar_lea.hbm %s7372_s6, %s4856_s14 }
  0x9f   : > { %v372_v9 = vunpack.c.l.bf16 %v368_v4  ;;  %v373_v10 = vunpack.c.h.bf16 %v368_v4  ;;  %v369_v11 = vpack.c.bf16 %v6435_v8, %v6432_v7  ;;  %v6443_v15 = vld [vmem:[%s6388_s16 + $0x38] sm:$0xff]  ;;  %v578_v36 = vsel %vm397_vm1, %v368_v4, 0  ;;  %v6499_v41 = vld [vmem:[%s7369_s3] sm:$0xff]   ;;  %v6529_v44 = vld [vmem:[#allocation8] sm:$0xff]   ;;  %s4600_s30 = sshll.u32 %s340_s12, 4  ;;  %p7415_p13 = scmp.ne.s32.totalorder %s7392_s9, 0  ;;  %s7319_s30 = int_to_ptr.vmem [resolvable:$true] %s4600_s30 }
  0xa0   : > { %v376_v13 = vunpack.c.l.bf16 %v370_v6  ;;  %v377_v14 = vunpack.c.h.bf16 %v370_v6  ;;  %v371_v25 = vpack.c.bf16 %v6443_v15, %v6440_v12  ;;  %v666_v39 = vsel %vm397_vm1, %v370_v6, 0  ;;  %v6527_v43 = vld [vmem:[%s7371_s5] sm:$0xff]   ;;  %v6541_v51 = vld [vmem:[%s6395_s7 + $0x8] sm:$0xff]  ;;  %s6038_s27 = scalar_lea.vmem %s7319_s30, 128  ;;  %s6128_s25 = smov [#allocation10]  }
  0xa1   : > { %v380_v16 = vsub.f32 %v6416_v1, %v372_v9  ;;  %v381_v17 = vsub.f32 %v6419_v2, %v373_v10  ;;  %v374_v18 = vunpack.c.l.bf16 %v369_v11  ;;  %v375_v19 = vunpack.c.h.bf16 %v369_v11  ;;  %v6538_v50 = vld [vmem:[%s6395_s7] sm:$0xff]  ;;  %p6039_p2 = scmp.ne.s32.totalorder %s7319_s30, %s6038_s27  ;;  %s6042_s18 = sshll.u32 %s6128_s25, 4  ;;  %s6043_s18 = int_to_ptr.vmem [resolvable:$false] %s6042_s18 }
  0xa2   : > { %v384_v20 = vsub.f32 %v6422_v3, %v376_v13  ;;  %v385_v21 = vsub.f32 %v6427_v5, %v377_v14  ;;  %v378_v30 = vunpack.c.l.bf16 %v371_v25  ;;  %v379_v31 = vunpack.c.h.bf16 %v371_v25  ;;  %s6044_s19 = scalar_lea.vmem %s6043_s18, 256  ;;  %p6045_p4 = scmp.lt.s32.totalorder %s7319_s30, %s6043_s18 }
  0xa3   : > { %v388_v22 = vpack.c.bf16 %v381_v17, %v380_v16  ;;  %v382_v23 = vsub.f32 %v6432_v7, %v374_v18  ;;  %v383_v24 = vsub.f32 %v6435_v8, %v375_v19  ;;  %v622_v40 = vsel %vm397_vm1, %v369_v11, 0  ;;  %p6040_p6 = pnand %p6039_p2, %p7415_p13  ;;  %p6046_p5 = scmp.lt.s32.totalorder %s6044_s19, %s6038_s27 }
  0xa4   : > { %v390_v26 = vpack.c.bf16 %v385_v21, %v384_v20  ;;  %v386_v34 = vsub.f32 %v6440_v12, %v378_v30  ;;  %v387_v35 = vsub.f32 %v6443_v15, %v379_v31  ;;  %v710_v42 = vsel %vm397_vm1, %v371_v25, 0  ;;  %v6554_v20 = vld [vmem:[%s6395_s7 + $0x10] sm:$0xff]  ;;  %v6557_v21 = vld [vmem:[%s6395_s7 + $0x18] sm:$0xff] }
  0xa5   : > { %v402_v27 = vsel %vm397_vm1, %v388_v22, 0  ;;  %v389_v29 = vpack.c.bf16 %v383_v24, %v382_v23  ;;  %v6545_v57 = vpack.c.bf16 %v6541_v51, %v6538_v50  ;;  %p6041_p10 = pneg %p6040_p6  ;;  %p6047_p3 = por %p6046_p5, %p6045_p4 }
  0xa6   : > { %5059 = vmatpush3.bf16.xpose.msra.mxu1 %v402_v27  ;;  %v490_v28 = vsel %vm397_vm1, %v390_v26, 0  ;;  %v391_v37 = vpack.c.bf16 %v387_v35, %v386_v34 }
  0xa7   : > { %5071 = vmatpush3.bf16.xpose.msra.mxu0 %v490_v28  ;;  %5064 = vmatprep.subr.bf16.mxu1 %v7376_v0  ;;  %v446_v33 = vsel %vm397_vm1, %v389_v29, 0  ;;  %v1200_v61 = vunpack.c.l.bf16 %v6545_v57  ;;  %v1201_v62 = vunpack.c.h.bf16 %v6545_v57  ;;  %v6561_v29 = vpack.c.bf16 %v6557_v21, %v6554_v20  ;;  %p6048_p7 = pnand %p6047_p3, %p6041_p10 }
  0xa8   : > { %5082 = vmatprep.subr.bf16.mxu0 %v7376_v0  ;;  %v534_v38 = vsel %vm397_vm1, %v391_v37, 0 }
  0xa9   : > { %v1208_v16 = vsub.f32 %v6538_v50, %v1200_v61  ;;  %v1209_v17 = vsub.f32 %v6541_v51, %v1201_v62  ;;  %v1203_v37 = vunpack.c.h.bf16 %v6561_v29 }
  0xab   : > { %v1216_v25 = vpack.c.bf16 %v1209_v17, %v1208_v16 }
  0xad   : > { %5061 = vmatmul.mubr.msk.bf16.vlgmr.msra.gmra.mrb[0].mxu1 %vm397_vm1, %v6457_v32 }
  0xae   : > { %5073 = vmatmul.mubr.msk.bf16.vlgmr.msra.gmra.mrb[0].mxu0 %vm397_vm1, %v6457_v32  ;;  %5065 = vmatpush3.bf16.xpose.msra.mxu1 %v446_v33  ;;  %v1221_v33 = vsel %vm397_vm1, %v1216_v25, 0 }
  0xaf   : > { %5083 = vmatpush3.bf16.xpose.msra.mxu0 %v578_v36  ;;  %5066 = vmatprep.mubr.msk.bf16.mxu1 %vm6127_vm0, %v7376_v0 }
  0xb0   : > { %5084 = vmatprep.mubr.msk.bf16.mxu0 %vm6127_vm0, %v7376_v0  ;;  %5076 = vmatprep.subr.bf16.mxu1 %v7376_v0 }
  0xb1   : > { %5094 = vmatprep.subr.bf16.mxu0 %v7376_v0 }
  0xb5   : > { %5067 = vmatmul.mubr.msk.bf16.vlgmr.msra.gmra.mrb[4].mxu1 %vm397_vm1, %v6457_v32 }
  0xb6   : > { %5085 = vmatmul.mubr.msk.bf16.vlgmr.msra.gmra.mrb[4].mxu0 %vm397_vm1, %v6457_v32  ;;  %5077 = vmatpush3.bf16.xpose.msra.mxu1 %v534_v38 }
  0xb7   : > { %5095 = vmatpush3.bf16.xpose.msra.mxu0 %v666_v39  ;;  %5078 = vmatprep.mubr.msk.bf16.mxu1 %vm6127_vm0, %v7376_v0 }
  0xb8   : > { %5096 = vmatprep.mubr.msk.bf16.mxu0 %vm6127_vm0, %v7376_v0  ;;  %5088 = vmatprep.subr.bf16.mxu1 %v7376_v0 }
  0xb9   : > { %5106 = vmatprep.subr.bf16.mxu0 %v7376_v0 }
  0xbd   : > { %5079 = vmatmul.mubr.msk.bf16.vlgmr.msra.gmra.mrb[8].mxu1 %vm397_vm1, %v6457_v32 }
  0xbe   : > { %5097 = vmatmul.mubr.msk.bf16.vlgmr.msra.gmra.mrb[0].mxu0 %vm397_vm1, %v6457_v32  ;;  %5089 = vmatpush3.bf16.xpose.msra.mxu1 %v622_v40 }
  0xbf   : > { %5107 = vmatpush3.bf16.xpose.msra.mxu0 %v578_v36  ;;  %5090 = vmatprep.mubr.msk.bf16.mxu1 %vm6127_vm0, %v7376_v0  ;;  %v1202_v36 = vunpack.c.l.bf16 %v6561_v29 }
  0xc0   : > { %5108 = vmatprep.mubr.msk.bf16.mxu0 %vm6127_vm0, %v7376_v0  ;;  %5100 = vmatprep.subr.bf16.mxu1 %v7376_v0 }
  0xc1   : > { %5118 = vmatprep.subr.bf16.mxu0 %v7376_v0 }
  0xc5   : > { %5091 = vmatmul.mubr.msk.bf16.vlgmr.msra.gmra.mrb[4].mxu1 %vm397_vm1, %v6457_v32 }
  0xc6   : > { %5109 = vmatmul.mubr.msk.bf16.vlgmr.msra.gmra.mrb[4].mxu0 %vm397_vm1, %v6499_v41  ;;  %5101 = vmatpush3.bf16.xpose.msra.mxu1 %v710_v42 }
  0xc7   : > { %5119 = vmatpush3.bf16.xpose.msra.mxu0 %v666_v39  ;;  %5102 = vmatprep.mubr.msk.bf16.mxu1 %vm6127_vm0, %v7376_v0 }
  0xc8   : > { %5120 = vmatprep.mubr.msk.bf16.mxu0 %vm6127_vm0, %v7376_v0  ;;  %5112 = vmatprep.subr.bf16.mxu1 %v7376_v0 }
  0xc9   : > { %5140 = vmatprep.subr.bf16.mxu0 %v6529_v44 }
  0xcd   : > { %5103 = vmatmul.mubr.msk.bf16.vlgmr.msra.gmra.mrb[8].mxu1 %vm397_vm1, %v6457_v32 }
  0xce   : > { %5121 = vmatmul.mubr.msk.bf16.vlgmr.msra.gmra.mrb[0].mxu0 %vm397_vm1, %v6499_v41  ;;  %5113 = vmatpush3.bf16.xpose.msra.mxu1 %v622_v40 }
  0xcf   : > { %5114 = vmatprep.mubr.msk.bf16.mxu1 %vm6127_vm0, %v7376_v0  ;;  %5124 = vmatprep.subr.bf16.mxu1 %v7376_v0 }
  0xd0   : > { %5141 = vmatpush3.bf16.msra.mxu0 %v6529_v44 }
  0xd1   : > { %5150 = vmatprep.subr.bf16.mxu0 %v6529_v44 }
  0xd5   : > { %5115 = vmatmul.mubr.msk.bf16.vlgmr.msra.gmra.mrb[4].mxu1 %vm397_vm1, %v6499_v41 }
  0xd6   : > { %5125 = vmatpush3.bf16.xpose.msra.mxu1 %v710_v42  ;;  %5126 = vmatprep.mubr.msk.bf16.mxu1 %vm6127_vm0, %v7376_v0  ;;  %v6573_v42 = vld [vmem:[%s6395_s7 + $0x20] sm:$0xff] }
  0xd7   : > { %5130 = vmatprep.subr.bf16.mxu1 %v6527_v43 }
  0xdd   : > { %5127 = vmatmul.mubr.msk.bf16.vlgmr.msra.gmra.mrb[8].mxu1 %vm397_vm1, %v6499_v41 }
  0xde   : > { %5131 = vmatpush3.bf16.msra.mxu1 %v6527_v43 }
  0xdf   : > { %5160 = vmatprep.subr.bf16.mxu1 %v7376_v0 }
 0x180   : > { %v438_v45 = vpop.f32.mrb[0].mxu1 }
 0x181   : > { %v5062_v46 = vpop.f32.mrb[1].mxu1 }
 0x182   : > { %v441_v47 = vpop.f32.mrb[2].mxu1 }
 0x183   : > { %v5063_v48 = vpop.f32.mrb[3].mxu1 }
 0x199   : > { %v795_v49 = vpop.f32.mrb[4].mxu0 }
 0x19a   : > { %v5568_v52 = vadd.f32 %v795_v49, %v438_v45  ;;  %v5110_v53 = vpop.f32.mrb[5].mxu0  ;;  %v6576_v45 = vld [vmem:[%s6395_s7 + $0x28] sm:$0xff]  ;;  %v1210_v49 = vsub.f32 %v6554_v20, %v1202_v36 }
 0x19b   : > { %v798_v54 = vpop.f32.mrb[6].mxu0 }
 0x19c   : > { %v5569_v55 = vadd.f32 %v798_v54, %v441_v47  ;;  %v5111_v56 = vpop.f32.mrb[7].mxu0 }
 0x19e   : > { %v933_v58 = vpack.c.bf16 %v5569_v55, %v5568_v52 }
 0x1a0   : > { %v937_v59 = vunpack.c.l.bf16 %v933_v58  ;;  %v938_v60 = vunpack.c.h.bf16 %v933_v58  ;;  %5132 = vmatprep.mubr.msk.bf16.mxu1 %vm397_vm1, %v933_v58  ;;  %5142 = vmatprep.mubr.msk.bf16.mxu0 %vm397_vm1, %v933_v58 }
 0x1a1   : > { %v877_v63 = vpop.f32.mrb[0].mxu0 }
 0x1a2   : > { %v945_v4 = vsub.f32 %v5568_v52, %v937_v59  ;;  %v946_v6 = vsub.f32 %v5569_v55, %v938_v60  ;;  %v5122_v9 = vpop.f32.mrb[1].mxu0  ;;  %v1211_v52 = vsub.f32 %v6557_v21, %v1203_v37  ;;  %v1198_v55 = vpack.c.bf16 %v6576_v45, %v6573_v42 }
 0x1a3   : > { %v880_v10 = vpop.f32.mrb[2].mxu0 }
 0x1a4   : > { %v953_v11 = vpack.c.bf16 %v946_v6, %v945_v4  ;;  %v935_v13 = vpack.c.bf16 %v880_v10, %v877_v63  ;;  %v5123_v14 = vpop.f32.mrb[3].mxu0  ;;  %v1217_v59 = vpack.c.bf16 %v1211_v52, %v1210_v49  ;;  %v1204_v62 = vunpack.c.l.bf16 %v1198_v55  ;;  %v6589_v4 = vld [vmem:[%s6395_s7 + $0x30] sm:$0xff]  ;;  %v6592_v6 = vld [vmem:[%s6395_s7 + $0x38] sm:$0xff] }
 0x1a6   : > { %v941_v18 = vunpack.c.l.bf16 %v935_v13  ;;  %v942_v19 = vunpack.c.h.bf16 %v935_v13 }
 0x1a8   : > { %v949_v22 = vsub.f32 %v877_v63, %v941_v18  ;;  %v950_v23 = vsub.f32 %v880_v10, %v942_v19  ;;  %v836_v24 = vpop.f32.mrb[4].mxu1  ;;  %v1205_v63 = vunpack.c.h.bf16 %v1198_v55  ;;  %v1265_v10 = vsel %vm397_vm1, %v1217_v59, 0 }
 0x1a9   : > { %v5116_v26 = vpop.f32.mrb[5].mxu1 }
 0x1aa   : > { %v955_v27 = vpack.c.bf16 %v950_v23, %v949_v22  ;;  %v839_v28 = vpop.f32.mrb[6].mxu1  ;;  %v1213_v14 = vsub.f32 %v6576_v45, %v1205_v63  ;;  %v1397_v26 = vsel %vm397_vm1, %v6545_v57, 0  ;;  %v1485_v57 = vsel %vm397_vm1, %v1198_v55, 0 }
 0x1ab   : > { %v934_v30 = vpack.c.bf16 %v839_v28, %v836_v24  ;;  %v5117_v31 = vpop.f32.mrb[7].mxu1 }
 0x1ad   : > { %v939_v34 = vunpack.c.l.bf16 %v934_v30  ;;  %v940_v35 = vunpack.c.h.bf16 %v934_v30  ;;  %5133 = vmatmul.mubr.msk.bf16.vlgmr.msra.gmra.mrb[12].mxu1 %vm397_vm1, %v934_v30  ;;  %5143 = vmatmul.mubr.msk.bf16.vlgmr.msra.gmra.mrb[8].mxu0 %vm397_vm1, %v934_v30  ;;  %v1998_v30 = vmul.f32 %v6435_v8, %v6435_v8 }
 0x1ae   : > { %5136 = vmatprep.mubr.msk.bf16.mxu1 %vm397_vm1, %v935_v13  ;;  %5146 = vmatprep.mubr.msk.bf16.mxu0 %vm397_vm1, %v935_v13  ;;  %v1212_v13 = vsub.f32 %v6573_v42, %v1204_v62  ;;  %v2805_v62 = vmul.f32 %v6557_v21, %v6557_v21 }
 0x1af   : > { %v947_v38 = vsub.f32 %v836_v24, %v939_v34  ;;  %v948_v39 = vsub.f32 %v839_v28, %v940_v35  ;;  %5161 = vmatpush3.bf16.xpose.msra.mxu1 %v1221_v33  ;;  %5151 = vmatpush3.bf16.msra.mxu0 %v6529_v44 }
 0x1b0   : > { %v918_v40 = vpop.f32.mrb[8].mxu1  ;;  %5166 = vmatprep.subr.bf16.mxu1 %v7376_v0  ;;  %5232 = vmatprep.subr.bf16.mxu0 %v6527_v43  ;;  %v1218_v16 = vpack.c.bf16 %v1213_v14, %v1212_v13 }
 0x1b1   : > { %v954_v46 = vpack.c.bf16 %v948_v39, %v947_v38  ;;  %v5128_v47 = vpop.f32.mrb[9].mxu1  ;;  %v2001_v38 = vmul.f32 %v6440_v12, %v6440_v12 }
 0x1b2   : > { %v921_v48 = vpop.f32.mrb[10].mxu1  ;;  %v1309_v19 = vsel %vm397_vm1, %v1218_v16, 0  ;;  %v2806_v16 = vmul.f32 %v6573_v42, %v6573_v42 }
 0x1b3   : > { %v936_v53 = vpack.c.bf16 %v921_v48, %v918_v40  ;;  %v5129_v54 = vpop.f32.mrb[11].mxu1 }
 0x1b4   : > { %v2803_v54 = vmul.f32 %v6541_v51, %v6541_v51 }
 0x1b5   : > { %v943_v56 = vunpack.c.l.bf16 %v936_v53  ;;  %v944_v58 = vunpack.c.h.bf16 %v936_v53  ;;  %5137 = vmatmul.mubr.msk.bf16.gmra.mrb[16].mxu1 %vm397_vm1, %v936_v53  ;;  %5147 = vmatmul.mubr.msk.bf16.gmra.mrb[12].mxu0 %vm397_vm1, %v936_v53  ;;  %v2802_v53 = vmul.f32 %v6538_v50, %v6538_v50 }
 0x1b6   : > { %5152 = vmatprep.mubr.msk.bf16.mxu0 %vm397_vm1, %v953_v11  ;;  %5162 = vmatprep.mubr.msk.bf16.mxu1 %vm6127_vm0, %v7376_v0  ;;  %v1199_v11 = vpack.c.bf16 %v6592_v6, %v6589_v4 }
 0x1b7   : > { %v951_v60 = vsub.f32 %v918_v40, %v943_v56  ;;  %v952_v61 = vsub.f32 %v921_v48, %v944_v58  ;;  %v2810_v55 = vpack.c.bf16 %v2803_v54, %v2802_v53 }
 0x1b8   : > { %v1206_v17 = vunpack.c.l.bf16 %v1199_v11  ;;  %v1207_v18 = vunpack.c.h.bf16 %v1199_v11  ;;  %v1529_v28 = vsel %vm397_vm1, %v1199_v11, 0 }
 0x1b9   : > { %v956_v9 = vpack.c.bf16 %v952_v61, %v951_v60  ;;  %v2814_v56 = vunpack.c.l.bf16 %v2810_v55  ;;  %v2815_v58 = vunpack.c.h.bf16 %v2810_v55  ;;  %v2804_v61 = vmul.f32 %v6554_v20, %v6554_v20 }
 0x1ba   : > { %v1214_v22 = vsub.f32 %v6589_v4, %v1206_v17  ;;  %v1215_v23 = vsub.f32 %v6592_v6, %v1207_v18  ;;  %v2807_v17 = vmul.f32 %v6576_v45, %v6576_v45  ;;  %v2808_v45 = vmul.f32 %v6589_v4, %v6589_v4 }
 0x1bb   : > { %v2822_v59 = vsub.f32 %v2802_v53, %v2814_v56  ;;  %v2823_v60 = vsub.f32 %v2803_v54, %v2815_v58  ;;  %v2811_v63 = vpack.c.bf16 %v2805_v62, %v2804_v61 }
 0x1bc   : > { %v1219_v24 = vpack.c.bf16 %v1215_v23, %v1214_v22 }
 0x1bd   : > { %5153 = vmatmul.mubr.msk.bf16.vlgmr.msra.gmra.mrb[8].mxu0 %vm397_vm1, %v954_v46  ;;  %5163 = vmatmul.mubr.msk.bf16.vlgmr.msra.gmra.mrb[20].mxu1 %vm397_vm1, %v6457_v32  ;;  %v2830_v50 = vpack.c.bf16 %v2823_v60, %v2822_v59 }
 0x1be   : > { %5156 = vmatprep.mubr.msk.bf16.mxu0 %vm397_vm1, %v955_v27  ;;  %5167 = vmatpush3.bf16.xpose.msra.mxu1 %v1265_v10  ;;  %v1353_v25 = vsel %vm397_vm1, %v1219_v24, 0  ;;  %v1441_v27 = vsel %vm397_vm1, %v6561_v29, 0  ;;  %v1997_v29 = vmul.f32 %v6432_v7, %v6432_v7  ;;  %v2002_v7 = vmul.f32 %v6443_v15, %v6443_v15 }
 0x1bf   : > { %5168 = vmatprep.mubr.msk.bf16.mxu1 %vm6127_vm0, %v7376_v0  ;;  %5172 = vmatprep.subr.bf16.mxu1 %v7376_v0  ;;  %v2835_v51 = vsel %vm397_vm1, %v2830_v50, 0  ;;  %v2817_v10 = vunpack.c.h.bf16 %v2811_v63 }
 0x1c0   : > { %5233 = vmatpush3.bf16.msra.mxu0 %v6527_v43  ;;  %v2004_v31 = vpack.c.bf16 %v1998_v30, %v1997_v29  ;;  %v2006_v39 = vpack.c.bf16 %v2002_v7, %v2001_v38 }
 0x1c1   : > { %5242 = vmatprep.subr.bf16.mxu0 %v6529_v44  ;;  %v2825_v14 = vsub.f32 %v2805_v62, %v2817_v10 }
 0x1c2   : > { %v2009_v33 = vunpack.c.l.bf16 %v2004_v31  ;;  %v2010_v34 = vunpack.c.h.bf16 %v2004_v31  ;;  %v2013_v40 = vunpack.c.l.bf16 %v2006_v39  ;;  %v2014_v46 = vunpack.c.h.bf16 %v2006_v39 }
 0x1c3   : > { %v2248_v12 = vsel %vm397_vm1, %v2004_v31, 0  ;;  %v2336_v15 = vsel %vm397_vm1, %v2006_v39, 0 }
 0x1c4   : > { %v2017_v35 = vsub.f32 %v1997_v29, %v2009_v33  ;;  %v2018_v36 = vsub.f32 %v1998_v30, %v2010_v34  ;;  %v2021_v47 = vsub.f32 %v2001_v38, %v2013_v40  ;;  %v2022_v48 = vsub.f32 %v2002_v7, %v2014_v46 }
 0x1c5   : > { %5157 = vmatmul.mubr.msk.bf16.gmra.mrb[12].mxu0 %vm397_vm1, %v956_v9  ;;  %5169 = vmatmul.mubr.msk.bf16.vlgmr.msra.gmra.mrb[24].mxu1 %vm397_vm1, %v6457_v32  ;;  %v2816_v9 = vunpack.c.l.bf16 %v2811_v63 }
 0x1c6   : > { %5173 = vmatpush3.bf16.xpose.msra.mxu1 %v1309_v19  ;;  %5174 = vmatprep.mubr.msk.bf16.mxu1 %vm6127_vm0, %v7376_v0  ;;  %v2024_v37 = vpack.c.bf16 %v2018_v36, %v2017_v35  ;;  %v2026_v49 = vpack.c.bf16 %v2022_v48, %v2021_v47  ;;  %v2812_v19 = vpack.c.bf16 %v2807_v17, %v2806_v16  ;;  %v3011_v35 = vsel %vm397_vm1, %v2810_v55, 0 }
 0x1c7   : > { %5178 = vmatprep.subr.bf16.mxu1 %v7376_v0  ;;  %v2824_v13 = vsub.f32 %v2804_v61, %v2816_v9  ;;  %v3055_v36 = vsel %vm397_vm1, %v2811_v63, 0 }
 0x1c8   : > { %v2072_v8 = vsel %vm397_vm1, %v2024_v37, 0  ;;  %v2160_v52 = vsel %vm397_vm1, %v2026_v49, 0  ;;  %v2818_v22 = vunpack.c.l.bf16 %v2812_v19  ;;  %v2819_v23 = vunpack.c.h.bf16 %v2812_v19 }
 0x1c9   : > { %v2831_v11 = vpack.c.bf16 %v2825_v14, %v2824_v13  ;;  %v3099_v37 = vsel %vm397_vm1, %v2812_v19, 0 }
 0x1ca   : > { %v2826_v24 = vsub.f32 %v2806_v16, %v2818_v22 }
 0x1cb   : > { %v2879_v18 = vsel %vm397_vm1, %v2831_v11, 0 }
 0x1cd   : > { %5175 = vmatmul.mubr.msk.bf16.vlgmr.msra.gmra.mrb[28].mxu1 %vm397_vm1, %v6457_v32 }
 0x1ce   : > { %5179 = vmatpush3.bf16.xpose.msra.mxu1 %v1353_v25  ;;  %5180 = vmatprep.mubr.msk.bf16.mxu1 %vm6127_vm0, %v7376_v0  ;;  %v2827_v25 = vsub.f32 %v2807_v17, %v2819_v23 }
 0x1cf   : > { %5184 = vmatprep.subr.bf16.mxu1 %v7376_v0 }
 0x1d0   : > { %v2832_v42 = vpack.c.bf16 %v2827_v25, %v2826_v24 }
 0x1d5   : > { %5181 = vmatmul.mubr.msk.bf16.vlgmr.msra.gmra.mrb[32].mxu1 %vm397_vm1, %v6457_v32 }
 0x1d6   : > { %5185 = vmatpush3.bf16.xpose.msra.mxu1 %v1397_v26  ;;  %5186 = vmatprep.mubr.msk.bf16.mxu1 %vm6127_vm0, %v7376_v0 }
 0x1d7   : > { %5190 = vmatprep.subr.bf16.mxu1 %v7376_v0 }
 0x1dd   : > { %5187 = vmatmul.mubr.msk.bf16.vlgmr.msra.gmra.mrb[20].mxu1 %vm397_vm1, %v6457_v32 }
 0x1de   : > { %5191 = vmatpush3.bf16.xpose.msra.mxu1 %v1441_v27  ;;  %5192 = vmatprep.mubr.msk.bf16.mxu1 %vm6127_vm0, %v7376_v0 }
 0x1df   : > { %5196 = vmatprep.subr.bf16.mxu1 %v7376_v0 }
 0x1e5   : > { %5193 = vmatmul.mubr.msk.bf16.vlgmr.msra.gmra.mrb[24].mxu1 %vm397_vm1, %v6457_v32 }
 0x1e6   : > { %5197 = vmatpush3.bf16.xpose.msra.mxu1 %v1485_v57  ;;  %5198 = vmatprep.mubr.msk.bf16.mxu1 %vm6127_vm0, %v7376_v0 }
 0x1e7   : > { %5202 = vmatprep.subr.bf16.mxu1 %v7376_v0 }
 0x1ed   : > { %5199 = vmatmul.mubr.msk.bf16.vlgmr.msra.gmra.mrb[28].mxu1 %vm397_vm1, %v6457_v32 }
 0x1ee   : > { %5203 = vmatpush3.bf16.xpose.msra.mxu1 %v1529_v28  ;;  %5204 = vmatprep.mubr.msk.bf16.mxu1 %vm6127_vm0, %v7376_v0 }
 0x1ef   : > { %5208 = vmatprep.subr.bf16.mxu1 %v7376_v0 }
 0x1f5   : > { %5205 = vmatmul.mubr.msk.bf16.vlgmr.msra.gmra.mrb[32].mxu1 %vm397_vm1, %v6457_v32 }
 0x1f6   : > { %5209 = vmatpush3.bf16.xpose.msra.mxu1 %v1397_v26  ;;  %5210 = vmatprep.mubr.msk.bf16.mxu1 %vm6127_vm0, %v7376_v0  ;;  %v2809_v26 = vmul.f32 %v6592_v6, %v6592_v6 }
 0x1f7   : > { %5214 = vmatprep.subr.bf16.mxu1 %v7376_v0 }
 0x1fd   : > { %5211 = vmatmul.mubr.msk.bf16.vlgmr.msra.gmra.mrb[20].mxu1 %vm397_vm1, %v6499_v41 }
 0x1fe   : > { %5215 = vmatpush3.bf16.xpose.msra.mxu1 %v1441_v27  ;;  %5216 = vmatprep.mubr.msk.bf16.mxu1 %vm6127_vm0, %v7376_v0  ;;  %v2923_v27 = vsel %vm397_vm1, %v2832_v42, 0 }
 0x1ff   : > { %5220 = vmatprep.subr.bf16.mxu1 %v7376_v0 }
 0x205   : > { %5217 = vmatmul.mubr.msk.bf16.vlgmr.msra.gmra.mrb[24].mxu1 %vm397_vm1, %v6499_v41 }
 0x206   : > { %5221 = vmatpush3.bf16.xpose.msra.mxu1 %v1485_v57  ;;  %5222 = vmatprep.mubr.msk.bf16.mxu1 %vm6127_vm0, %v7376_v0  ;;  %v2813_v57 = vpack.c.bf16 %v2809_v26, %v2808_v45 }
 0x207   : > { %5226 = vmatprep.subr.bf16.mxu1 %v7376_v0 }
 0x208   : > { %v2821_v29 = vunpack.c.h.bf16 %v2813_v57  ;;  %v3143_v38 = vsel %vm397_vm1, %v2813_v57, 0 }
 0x20a   : > { %v2829_v31 = vsub.f32 %v2809_v26, %v2821_v29 }
 0x20d   : > { %5223 = vmatmul.mubr.msk.bf16.vlgmr.msra.gmra.mrb[28].mxu1 %vm397_vm1, %v6499_v41 }
 0x20e   : > { %5227 = vmatpush3.bf16.xpose.msra.mxu1 %v1529_v28  ;;  %5228 = vmatprep.mubr.msk.bf16.mxu1 %vm6127_vm0, %v7376_v0  ;;  %v2820_v28 = vunpack.c.l.bf16 %v2813_v57 }
 0x20f   : > { %5268 = vmatprep.subr.bf16.mxu1 %v7376_v0 }
 0x210   : > { %v2828_v30 = vsub.f32 %v2808_v45, %v2820_v28 }
 0x212   : > { %v2833_v33 = vpack.c.bf16 %v2829_v31, %v2828_v30 }
 0x214   : > { %v2967_v34 = vsel %vm397_vm1, %v2833_v33, 0 }
 0x215   : > { %5229 = vmatmul.mubr.msk.bf16.vlgmr.msra.gmra.mrb[32].mxu1 %vm397_vm1, %v6499_v41 }
 0x216   : > { %5270 = vmatprep.mubr.msk.bf16.mxu1 %vm6127_vm0, %v7376_v0  ;;  %5269 = vmatpush3.bf16.xpose.msra.mxu1 %v2072_v8 }
 0x217   : > { %5280 = vmatprep.subr.bf16.mxu1 %v7376_v0 }
 0x21d   : > { %5271 = vmatmul.mubr.msk.bf16.vlgmr.msra.gmra.mrb[36].mxu1 %vm397_vm1, %v6457_v32 }
 0x21e   : > { %5281 = vmatpush3.bf16.xpose.msra.mxu1 %v2160_v52  ;;  %5282 = vmatprep.mubr.msk.bf16.mxu1 %vm6127_vm0, %v7376_v0 }
 0x21f   : > { %5292 = vmatprep.subr.bf16.mxu1 %v7376_v0 }
 0x225   : > { %5283 = vmatmul.mubr.msk.bf16.vlgmr.msra.gmra.mrb[40].mxu1 %vm397_vm1, %v6457_v32 }
 0x226   : > { %5293 = vmatpush3.bf16.xpose.msra.mxu1 %v2248_v12  ;;  %5294 = vmatprep.mubr.msk.bf16.mxu1 %vm6127_vm0, %v7376_v0 }
 0x227   : > { %5304 = vmatprep.subr.bf16.mxu1 %v7376_v0 }
 0x22d   : > { %5295 = vmatmul.mubr.msk.bf16.vlgmr.msra.gmra.mrb[36].mxu1 %vm397_vm1, %v6457_v32 }
 0x22e   : > { %5305 = vmatpush3.bf16.xpose.msra.mxu1 %v2336_v15  ;;  %5306 = vmatprep.mubr.msk.bf16.mxu1 %vm6127_vm0, %v7376_v0 }
 0x22f   : > { %5316 = vmatprep.subr.bf16.mxu1 %v7376_v0 }
 0x235   : > { %5307 = vmatmul.mubr.msk.bf16.vlgmr.msra.gmra.mrb[40].mxu1 %vm397_vm1, %v6457_v32 }
 0x236   : > { %5317 = vmatpush3.bf16.xpose.msra.mxu1 %v2248_v12  ;;  %5318 = vmatprep.mubr.msk.bf16.mxu1 %vm6127_vm0, %v7376_v0 }
 0x237   : > { %5328 = vmatprep.subr.bf16.mxu1 %v7376_v0 }
 0x23d   : > { %5319 = vmatmul.mubr.msk.bf16.vlgmr.msra.gmra.mrb[36].mxu1 %vm397_vm1, %v6499_v41 }
 0x23e   : > { %5329 = vmatpush3.bf16.xpose.msra.mxu1 %v2336_v15  ;;  %5330 = vmatprep.mubr.msk.bf16.mxu1 %vm6127_vm0, %v7376_v0 }
 0x23f   : > { %5364 = vmatprep.subr.bf16.mxu1 %v7376_v0 }
 0x245   : > { %5331 = vmatmul.mubr.msk.bf16.vlgmr.msra.gmra.mrb[40].mxu1 %vm397_vm1, %v6499_v41 }
 0x246   : > { %5365 = vmatpush3.bf16.xpose.msra.mxu1 %v2835_v51  ;;  %5366 = vmatprep.mubr.msk.bf16.mxu1 %vm6127_vm0, %v7376_v0 }
 0x247   : > { %5370 = vmatprep.subr.bf16.mxu1 %v7376_v0 }
 0x24d   : > { %5367 = vmatmul.mubr.msk.bf16.vlgmr.msra.gmra.mrb[44].mxu1 %vm397_vm1, %v6457_v32 }
 0x24e   : > { %5371 = vmatpush3.bf16.xpose.msra.mxu1 %v2879_v18  ;;  %5372 = vmatprep.mubr.msk.bf16.mxu1 %vm6127_vm0, %v7376_v0 }
 0x24f   : > { %5376 = vmatprep.subr.bf16.mxu1 %v7376_v0 }
 0x255   : > { %5373 = vmatmul.mubr.msk.bf16.vlgmr.msra.gmra.mrb[48].mxu1 %vm397_vm1, %v6457_v32 }
 0x256   : > { %5377 = vmatpush3.bf16.xpose.msra.mxu1 %v2923_v27  ;;  %5378 = vmatprep.mubr.msk.bf16.mxu1 %vm6127_vm0, %v7376_v0 }
 0x257   : > { %5382 = vmatprep.subr.bf16.mxu1 %v7376_v0 }
 0x25d   : > { %5379 = vmatmul.mubr.msk.bf16.vlgmr.msra.gmra.mrb[52].mxu1 %vm397_vm1, %v6457_v32 }
 0x25e   : > { %5383 = vmatpush3.bf16.xpose.msra.mxu1 %v2967_v34  ;;  %5384 = vmatprep.mubr.msk.bf16.mxu1 %vm6127_vm0, %v7376_v0 }
 0x25f   : > { %5388 = vmatprep.subr.bf16.mxu1 %v7376_v0 }
 0x265   : > { %5385 = vmatmul.mubr.msk.bf16.vlgmr.msra.gmra.mrb[56].mxu1 %vm397_vm1, %v6457_v32 }
 0x266   : > { %5389 = vmatpush3.bf16.xpose.msra.mxu1 %v3011_v35  ;;  %5390 = vmatprep.mubr.msk.bf16.mxu1 %vm6127_vm0, %v7376_v0 }
 0x267   : > { %5394 = vmatprep.subr.bf16.mxu1 %v7376_v0 }
 0x26d   : > { %5391 = vmatmul.mubr.msk.bf16.vlgmr.msra.gmra.mrb[44].mxu1 %vm397_vm1, %v6457_v32 }
 0x26e   : > { %5395 = vmatpush3.bf16.xpose.msra.mxu1 %v3055_v36  ;;  %5396 = vmatprep.mubr.msk.bf16.mxu1 %vm6127_vm0, %v7376_v0 }
 0x26f   : > { %5400 = vmatprep.subr.bf16.mxu1 %v7376_v0 }
 0x275   : > { %5397 = vmatmul.mubr.msk.bf16.vlgmr.msra.gmra.mrb[48].mxu1 %vm397_vm1, %v6457_v32 }
 0x276   : > { %5401 = vmatpush3.bf16.xpose.msra.mxu1 %v3099_v37  ;;  %5402 = vmatprep.mubr.msk.bf16.mxu1 %vm6127_vm0, %v7376_v0 }
 0x277   : > { %5406 = vmatprep.subr.bf16.mxu1 %v7376_v0 }
 0x27d   : > { %5403 = vmatmul.mubr.msk.bf16.vlgmr.msra.gmra.mrb[52].mxu1 %vm397_vm1, %v6457_v32 }
 0x27e   : > { %5407 = vmatpush3.bf16.xpose.msra.mxu1 %v3143_v38  ;;  %5408 = vmatprep.mubr.msk.bf16.mxu1 %vm6127_vm0, %v7376_v0 }
 0x27f   : > { %5412 = vmatprep.subr.bf16.mxu1 %v7376_v0 }
 0x280   : > { %v5134_v7 = vpop.f32.mrb[12].mxu1 }
 0x281   : > { %v1009_v8 = vpop.f32.mrb[13].mxu1 }
 0x282   : > { %v5135_v39 = vpop.f32.mrb[14].mxu1 }
 0x283   : > { %v1012_v40 = vpop.f32.mrb[15].mxu1 }
 0x285   : > { %5409 = vmatmul.mubr.msk.bf16.vlgmr.msra.gmra.mrb[56].mxu1 %vm397_vm1, %v6457_v32 }
 0x286   : > { %5413 = vmatpush3.bf16.xpose.msra.mxu1 %v3011_v35  ;;  %5414 = vmatprep.mubr.msk.bf16.mxu1 %vm6127_vm0, %v7376_v0 }
 0x287   : > { %5418 = vmatprep.subr.bf16.mxu1 %v7376_v0 }
 0x288   : > { %v5138_v46 = vpop.f32.mrb[16].mxu1 }
 0x289   : > { %v1025_v47 = vpop.f32.mrb[17].mxu1 }
 0x28a   : > { %v5139_v48 = vpop.f32.mrb[18].mxu1 }
 0x28b   : > { %v1028_v49 = vpop.f32.mrb[19].mxu1 }
 0x28d   : > { %5415 = vmatmul.mubr.msk.bf16.vlgmr.msra.gmra.mrb[44].mxu1 %vm397_vm1, %v6499_v41 }
 0x28e   : > { %5419 = vmatpush3.bf16.xpose.msra.mxu1 %v3055_v36  ;;  %5420 = vmatprep.mubr.msk.bf16.mxu1 %vm6127_vm0, %v7376_v0 }
 0x28f   : > { %5424 = vmatprep.subr.bf16.mxu1 %v7376_v0 }
 0x290   : > { %v5154_v52 = vpop.f32.mrb[8].mxu0 }
 0x291   : > { %v6780_v12 = vadd.f32 %v5154_v52, %v5134_v7  ;;  %v1157_v15 = vpop.f32.mrb[9].mxu0 }
 0x292   : > { %v6784_v53 = vadd.f32 %v1157_v15, %v1009_v8  ;;  %v5155_v54 = vpop.f32.mrb[10].mxu0 }
 0x293   : > { %v6788_v55 = vadd.f32 %v5155_v54, %v5135_v39  ;;  %v1160_v56 = vpop.f32.mrb[11].mxu0 }
 0x294   : > { %v6791_v58 = vadd.f32 %v1160_v56, %v1012_v40 }
 0x295   : > { %5421 = vmatmul.mubr.msk.bf16.vlgmr.msra.gmra.mrb[48].mxu1 %vm397_vm1, %v6499_v41 }
 0x296   : > { %5425 = vmatpush3.bf16.xpose.msra.mxu1 %v3099_v37  ;;  %5426 = vmatprep.mubr.msk.bf16.mxu1 %vm6127_vm0, %v7376_v0 }
 0x297   : > { %5430 = vmatprep.subr.bf16.mxu1 %v7376_v0 }
 0x298   : > { %v5158_v59 = vpop.f32.mrb[12].mxu0 }
 0x299   : > { %v6793_v60 = vadd.f32 %v5158_v59, %v5138_v46  ;;  %v1173_v50 = vpop.f32.mrb[13].mxu0  ;;  %v1995_v59 = vmul.f32 %v6416_v1, %v6416_v1 }
 0x29a   : > { %v6797_v51 = vadd.f32 %v1173_v50, %v1025_v47  ;;  %v5159_v61 = vpop.f32.mrb[14].mxu0  ;;  %v1996_v50 = vmul.f32 %v6419_v2, %v6419_v2  ;;  %v1999_v2 = vmul.f32 %v6422_v3, %v6422_v3 }
 0x29b   : > { %v6801_v62 = vadd.f32 %v5159_v61, %v5139_v48  ;;  %v1176_v63 = vpop.f32.mrb[15].mxu0 }
 0x29c   : > { %v6804_v9 = vadd.f32 %v1176_v63, %v1028_v49  ;;  %v2003_v63 = vpack.c.bf16 %v1996_v50, %v1995_v59 }
 0x29d   : > { %5427 = vmatmul.mubr.msk.bf16.vlgmr.msra.gmra.mrb[52].mxu1 %vm397_vm1, %v6499_v41 }
 0x29e   : > { %5431 = vmatpush3.bf16.xpose.msra.mxu1 %v3143_v38  ;;  %5432 = vmatprep.mubr.msk.bf16.mxu1 %vm6127_vm0, %v7376_v0 }
 0x29f   : > { %5472 = vmatprep.subr.bf16.mxu1 %v7376_v0 }
 0x2a5   : > { %5433 = vmatmul.mubr.msk.bf16.vlgmr.msra.gmra.mrb[56].mxu1 %vm397_vm1, %v6499_v41 }
 0x2a6   : > { %5474 = vmatprep.mubr.msk.bf16.mxu1 %vm6127_vm0, %v7376_v0 }
 0x2d0   : > { %v1606_v10 = vpop.f32.mrb[20].mxu1 }
 0x2d1   : > { %v5212_v13 = vpop.f32.mrb[21].mxu1 }
 0x2d2   : > { %v1609_v14 = vpop.f32.mrb[22].mxu1  ;;  %v2008_v13 = vunpack.c.h.bf16 %v2003_v63 }
 0x2d3   : > { %v1744_v11 = vpack.c.bf16 %v1609_v14, %v1606_v10  ;;  %v5213_v16 = vpop.f32.mrb[23].mxu1 }
 0x2d4   : > { %v2000_v16 = vmul.f32 %v6427_v5, %v6427_v5 }
 0x2d5   : > { %v1748_v17 = vunpack.c.l.bf16 %v1744_v11  ;;  %v1749_v18 = vunpack.c.h.bf16 %v1744_v11  ;;  %5234 = vmatprep.mubr.msk.bf16.mxu0 %vm397_vm1, %v1744_v11 }
 0x2d7   : > { %v1756_v19 = vsub.f32 %v1606_v10, %v1748_v17  ;;  %v1757_v22 = vsub.f32 %v1609_v14, %v1749_v18  ;;  %v2007_v10 = vunpack.c.l.bf16 %v2003_v63  ;;  %v2005_v18 = vpack.c.bf16 %v2000_v16, %v1999_v2 }
 0x2d8   : > { %v1647_v23 = vpop.f32.mrb[24].mxu1 }
 0x2d9   : > { %v1764_v24 = vpack.c.bf16 %v1757_v22, %v1756_v19  ;;  %v5218_v25 = vpop.f32.mrb[25].mxu1  ;;  %v2015_v14 = vsub.f32 %v1995_v59, %v2007_v10  ;;  %v2011_v19 = vunpack.c.l.bf16 %v2005_v18  ;;  %v2012_v22 = vunpack.c.h.bf16 %v2005_v18 }
 0x2da   : > { %v1650_v42 = vpop.f32.mrb[26].mxu1 }
 0x2db   : > { %v1745_v45 = vpack.c.bf16 %v1650_v42, %v1647_v23  ;;  %v5219_v26 = vpop.f32.mrb[27].mxu1 }
 0x2dd   : > { %v1750_v27 = vunpack.c.l.bf16 %v1745_v45  ;;  %v1751_v57 = vunpack.c.h.bf16 %v1745_v45  ;;  %5235 = vmatmul.mubr.msk.bf16.vlgmr.msra.gmra.mrb[16].mxu0 %vm397_vm1, %v1745_v45 }
 0x2de   : > { %5243 = vmatpush3.bf16.msra.mxu0 %v6529_v44 }
 0x2df   : > { %v1758_v28 = vsub.f32 %v1647_v23, %v1750_v27  ;;  %v1759_v29 = vsub.f32 %v1650_v42, %v1751_v57  ;;  %5252 = vmatprep.subr.bf16.mxu0 %v6529_v44  ;;  %v2019_v23 = vsub.f32 %v1999_v2, %v2011_v19 }
 0x2e0   : > { %v1688_v30 = vpop.f32.mrb[28].mxu1 }
 0x2e1   : > { %v1765_v31 = vpack.c.bf16 %v1759_v29, %v1758_v28  ;;  %v5224_v33 = vpop.f32.mrb[29].mxu1  ;;  %v2204_v29 = vsel %vm397_vm1, %v2003_v63, 0 }
 0x2e2   : > { %v1691_v34 = vpop.f32.mrb[30].mxu1 }
 0x2e3   : > { %v1746_v35 = vpack.c.bf16 %v1691_v34, %v1688_v30  ;;  %v5225_v36 = vpop.f32.mrb[31].mxu1 }
 0x2e5   : > { %v1752_v37 = vunpack.c.l.bf16 %v1746_v35  ;;  %v1753_v38 = vunpack.c.h.bf16 %v1746_v35  ;;  %5238 = vmatprep.mubr.msk.bf16.mxu0 %vm397_vm1, %v1746_v35 }
 0x2e7   : > { %v1760_v7 = vsub.f32 %v1688_v30, %v1752_v37  ;;  %v1761_v8 = vsub.f32 %v1691_v34, %v1753_v38 }
 0x2e8   : > { %v1729_v39 = vpop.f32.mrb[32].mxu1 }
 0x2e9   : > { %v1766_v40 = vpack.c.bf16 %v1761_v8, %v1760_v7  ;;  %v5230_v46 = vpop.f32.mrb[33].mxu1 }
 0x2ea   : > { %v1732_v47 = vpop.f32.mrb[34].mxu1 }
 0x2eb   : > { %v1747_v48 = vpack.c.bf16 %v1732_v47, %v1729_v39  ;;  %v5231_v49 = vpop.f32.mrb[35].mxu1 }
 0x2ed   : > { %v1754_v52 = vunpack.c.l.bf16 %v1747_v48  ;;  %v1755_v15 = vunpack.c.h.bf16 %v1747_v48  ;;  %5239 = vmatmul.mubr.msk.bf16.gmra.mrb[20].mxu0 %vm397_vm1, %v1747_v48 }
 0x2ee   : > { %5244 = vmatprep.mubr.msk.bf16.mxu0 %vm397_vm1, %v1744_v11  ;;  %v2016_v11 = vsub.f32 %v1996_v50, %v2008_v13 }
 0x2ef   : > { %v1762_v54 = vsub.f32 %v1729_v39, %v1754_v52  ;;  %v1763_v56 = vsub.f32 %v1732_v47, %v1755_v15  ;;  %v2292_v39 = vsel %vm397_vm1, %v2005_v18, 0  ;;  %v7088_v47 = vld [vmem:[#allocation8] sm:$0xff]  }
 0x2f0   : > { %v2023_v1 = vpack.c.bf16 %v2016_v11, %v2015_v14 }
 0x2f1   : > { %v1767_v61 = vpack.c.bf16 %v1763_v56, %v1762_v54 }
 0x2f2   : > { %v2028_v17 = vsel %vm397_vm1, %v2023_v1, 0 }
 0x2f5   : > { %5245 = vmatmul.mubr.msk.bf16.vlgmr.msra.gmra.mrb[16].mxu0 %vm397_vm1, %v1745_v45 }
 0x2f6   : > { %5248 = vmatprep.mubr.msk.bf16.mxu0 %vm397_vm1, %v1746_v35  ;;  %5253 = vmatpush3.bf16.msra.mxu0 %v6529_v44 }
 0x2f7   : > { %5262 = vmatprep.subr.bf16.mxu0 %v7376_v0 }
 0x2fd   : > { %5249 = vmatmul.mubr.msk.bf16.gmra.mrb[20].mxu0 %vm397_vm1, %v1747_v48 }
 0x2fe   : > { %5254 = vmatprep.mubr.msk.bf16.mxu0 %vm397_vm1, %v1764_v24  ;;  %v2020_v24 = vsub.f32 %v2000_v16, %v2012_v22 }
 0x300   : > { %v2025_v3 = vpack.c.bf16 %v2020_v24, %v2019_v23 }
 0x302   : > { %v2116_v5 = vsel %vm397_vm1, %v2025_v3, 0 }
 0x305   : > { %5255 = vmatmul.mubr.msk.bf16.vlgmr.msra.gmra.mrb[16].mxu0 %vm397_vm1, %v1765_v31 }
 0x306   : > { %5258 = vmatprep.mubr.msk.bf16.mxu0 %vm397_vm1, %v1766_v40  ;;  %5263 = vmatpush3.bf16.xpose.msra.mxu0 %v2028_v17 }
 0x307   : > { %5274 = vmatprep.subr.bf16.mxu0 %v7376_v0 }
 0x30d   : > { %5259 = vmatmul.mubr.msk.bf16.gmra.mrb[20].mxu0 %vm397_vm1, %v1767_v61 }
 0x30e   : > { %5264 = vmatprep.mubr.msk.bf16.mxu0 %vm6127_vm0, %v7376_v0 }
 0x310   : > { %v2454_v25 = vpop.f32.mrb[36].mxu1 }
 0x311   : > { %v5320_v42 = vpop.f32.mrb[37].mxu1 }
 0x312   : > { %v2457_v45 = vpop.f32.mrb[38].mxu1 }
 0x313   : > { %v6849_v26 = vpack.c.bf16 %v2457_v45, %v2454_v25  ;;  %v5321_v27 = vpop.f32.mrb[39].mxu1 }
 0x315   : > { %5265 = vmatmul.mubr.msk.bf16.vlgmr.msra.gmra.mrb[24].mxu0 %vm397_vm1, %v6457_v32  ;;  %v2557_v57 = vunpack.c.l.bf16 %v6849_v26  ;;  %v2558_v28 = vunpack.c.h.bf16 %v6849_v26 }
 0x316   : > { %5275 = vmatpush3.bf16.xpose.msra.mxu0 %v2116_v5  ;;  %5276 = vmatprep.mubr.msk.bf16.mxu0 %vm6127_vm0, %v7376_v0 }
 0x317   : > { %5286 = vmatprep.subr.bf16.mxu0 %v7376_v0  ;;  %v6854_v30 = vsub.f32 %v2454_v25, %v2557_v57  ;;  %v6856_v31 = vsub.f32 %v2457_v45, %v2558_v28 }
 0x318   : > { %v2536_v33 = vpop.f32.mrb[40].mxu1 }
 0x319   : > { %v5332_v35 = vpop.f32.mrb[41].mxu1 }
 0x31a   : > { %v2539_v36 = vpop.f32.mrb[42].mxu1 }
 0x31b   : > { %v6865_v37 = vpack.c.bf16 %v2539_v36, %v2536_v33  ;;  %v5333_v38 = vpop.f32.mrb[43].mxu1 }
 0x31d   : > { %5277 = vmatmul.mubr.msk.bf16.vlgmr.msra.gmra.mrb[28].mxu0 %vm397_vm1, %v6457_v32  ;;  %v2561_v7 = vunpack.c.l.bf16 %v6865_v37  ;;  %v2562_v8 = vunpack.c.h.bf16 %v6865_v37 }
 0x31e   : > { %5287 = vmatpush3.bf16.xpose.msra.mxu0 %v2204_v29  ;;  %5288 = vmatprep.mubr.msk.bf16.mxu0 %vm6127_vm0, %v7376_v0 }
 0x31f   : > { %5298 = vmatprep.subr.bf16.mxu0 %v7376_v0  ;;  %v6870_v40 = vsub.f32 %v2536_v33, %v2561_v7  ;;  %v6872_v46 = vsub.f32 %v2539_v36, %v2562_v8  ;;  %v5906_v7 = vld [vmem:[%s6388_s16 + $0x10] sm:$0xff] }
 0x320   : > { %v3611_v8 = vmul.f32 %v5906_v7, %v6554_v20 }
 0x325   : > { %5289 = vmatmul.mubr.msk.bf16.vlgmr.msra.gmra.mrb[24].mxu0 %vm397_vm1, %v6457_v32 }
 0x326   : > { %5299 = vmatpush3.bf16.xpose.msra.mxu0 %v2292_v39  ;;  %5300 = vmatprep.mubr.msk.bf16.mxu0 %vm6127_vm0, %v7376_v0 }
 0x327   : > { %5310 = vmatprep.subr.bf16.mxu0 %v7376_v0 }
 0x32d   : > { %5301 = vmatmul.mubr.msk.bf16.vlgmr.msra.gmra.mrb[28].mxu0 %vm397_vm1, %v6457_v32 }
 0x32e   : > { %5311 = vmatpush3.bf16.xpose.msra.mxu0 %v2204_v29  ;;  %5312 = vmatprep.mubr.msk.bf16.mxu0 %vm6127_vm0, %v7376_v0 }
 0x32f   : > { %5322 = vmatprep.subr.bf16.mxu0 %v7376_v0 }
 0x335   : > { %5313 = vmatmul.mubr.msk.bf16.vlgmr.msra.gmra.mrb[24].mxu0 %vm397_vm1, %v6499_v41 }
 0x336   : > { %5323 = vmatpush3.bf16.xpose.msra.mxu0 %v2292_v39  ;;  %5324 = vmatprep.mubr.msk.bf16.mxu0 %vm6127_vm0, %v7376_v0  ;;  %v5907_v39 = vld [vmem:[%s6388_s16 + $0x18] sm:$0xff] }
 0x337   : > { %5334 = vmatprep.subr.bf16.mxu0 %v6527_v43 }
 0x33d   : > { %5325 = vmatmul.mubr.msk.bf16.vlgmr.msra.gmra.mrb[28].mxu0 %vm397_vm1, %v6499_v41 }
 0x33e   : > { %5335 = vmatpush3.bf16.msra.mxu0 %v6527_v43 }
 0x33f   : > { %5344 = vmatprep.subr.bf16.mxu0 %v6529_v44 }
 0x360   : > { %v3220_v32 = vpop.f32.mrb[44].mxu1 }
 0x361   : > { %v5416_v48 = vpop.f32.mrb[45].mxu1 }
 0x362   : > { %v3223_v49 = vpop.f32.mrb[46].mxu1 }
 0x363   : > { %v6895_v52 = vpack.c.bf16 %v3223_v49, %v3220_v32  ;;  %v5417_v15 = vpop.f32.mrb[47].mxu1 }
 0x365   : > { %v3362_v54 = vunpack.c.l.bf16 %v6895_v52  ;;  %v3363_v56 = vunpack.c.h.bf16 %v6895_v52 }
 0x367   : > { %v6899_v59 = vsub.f32 %v3220_v32, %v3362_v54  ;;  %v6901_v50 = vsub.f32 %v3223_v49, %v3363_v56  ;;  %v3612_v32 = vmul.f32 %v5907_v39, %v6557_v21  ;;  %v6978_v39 = vmul.f32 %v6784_v53, %v6784_v53 }
 0x368   : > { %v3261_v61 = vpop.f32.mrb[48].mxu1 }
 0x369   : > { %v5422_v43 = vpop.f32.mrb[49].mxu1  ;;  %v3618_v48 = vpack.c.bf16 %v3612_v32, %v3611_v8 }
 0x36a   : > { %v3264_v44 = vpop.f32.mrb[50].mxu1  ;;  %v5908_v43 = vld [vmem:[%s6388_s16 + $0x30] sm:$0xff] }
 0x36b   : > { %v6905_v63 = vpack.c.bf16 %v3264_v44, %v3261_v61  ;;  %v5423_v10 = vpop.f32.mrb[51].mxu1  ;;  %v3623_v49 = vunpack.c.l.bf16 %v3618_v48  ;;  %v3624_v15 = vunpack.c.h.bf16 %v3618_v48 }
 0x36c   : > { %v5909_v10 = vld [vmem:[%s6388_s16 + $0x38] sm:$0xff] }
 0x36d   : > { %v3364_v13 = vunpack.c.l.bf16 %v6905_v63  ;;  %v3365_v14 = vunpack.c.h.bf16 %v6905_v63  ;;  %v3631_v54 = vsub.f32 %v3611_v8, %v3623_v49  ;;  %v3632_v56 = vsub.f32 %v3612_v32, %v3624_v15 }
 0x36f   : > { %v6909_v11 = vsub.f32 %v3261_v61, %v3364_v13  ;;  %v6911_v1 = vsub.f32 %v3264_v44, %v3365_v14  ;;  %v3638_v61 = vpack.c.bf16 %v3632_v56, %v3631_v54  ;;  %v3615_v44 = vmul.f32 %v5908_v43, %v6589_v4 }
 0x370   : > { %v3302_v2 = vpop.f32.mrb[52].mxu1  ;;  %v3616_v13 = vmul.f32 %v5909_v10, %v6592_v6  ;;  %v3862_v6 = vsel %vm397_vm1, %v3618_v48, 0  ;;  %v7003_v56 = vmul.f32 %v6788_v55, %v6788_v55 }
 0x371   : > { %v5428_v17 = vpop.f32.mrb[53].mxu1  ;;  %v3686_v14 = vsel %vm397_vm1, %v3638_v61, 0  ;;  %v7007_v61 = vmul.f32 %v6791_v58, %v6791_v58 }
 0x372   : > { %v3305_v18 = vpop.f32.mrb[54].mxu1  ;;  %5473 = vmatpush3.bf16.xpose.msra.mxu1 %v3686_v14 }
 0x373   : > { %v6915_v19 = vpack.c.bf16 %v3305_v18, %v3302_v2  ;;  %v5429_v22 = vpop.f32.mrb[55].mxu1  ;;  %5484 = vmatprep.subr.bf16.mxu1 %v7376_v0 }
 0x375   : > { %v3366_v23 = vunpack.c.l.bf16 %v6915_v19  ;;  %v3367_v24 = vunpack.c.h.bf16 %v6915_v19 }
 0x377   : > { %v6919_v3 = vsub.f32 %v3302_v2, %v3366_v23  ;;  %v6921_v5 = vsub.f32 %v3305_v18, %v3367_v24  ;;  %v3620_v2 = vpack.c.bf16 %v3616_v13, %v3615_v44  ;;  %v6945_v23 = vld [vmem:[#allocation7] sm:$0xff]  }
 0x378   : > { %v3343_v25 = vpop.f32.mrb[56].mxu1 }
 0x379   : > { %v5434_v45 = vpop.f32.mrb[57].mxu1  ;;  %v3627_v20 = vunpack.c.l.bf16 %v3620_v2  ;;  %v3628_v21 = vunpack.c.h.bf16 %v3620_v2  ;;  %5475 = vmatmul.mubr.msk.bf16.vlgmr.msra.gmra.mrb[60].mxu1 %vm397_vm1, %v6945_v23 }
 0x37a   : > { %v3346_v27 = vpop.f32.mrb[58].mxu1  ;;  %5486 = vmatprep.mubr.msk.bf16.mxu1 %vm6127_vm0, %v7376_v0 }
 0x37b   : > { %v6925_v57 = vpack.c.bf16 %v3346_v27, %v3343_v25  ;;  %v5435_v28 = vpop.f32.mrb[59].mxu1  ;;  %v3635_v17 = vsub.f32 %v3615_v44, %v3627_v20  ;;  %v3636_v18 = vsub.f32 %v3616_v13, %v3628_v21 }
 0x37d   : > { %v3368_v29 = vunpack.c.l.bf16 %v6925_v57  ;;  %v3369_v33 = vunpack.c.h.bf16 %v6925_v57  ;;  %v3640_v22 = vpack.c.bf16 %v3636_v18, %v3635_v17 }
 0x37f   : > { %v6929_v35 = vsub.f32 %v3343_v25, %v3368_v29  ;;  %v6931_v36 = vsub.f32 %v3346_v27, %v3369_v33  ;;  %v3774_v4 = vsel %vm397_vm1, %v3640_v22, 0  ;;  %v3950_v25 = vsel %vm397_vm1, %v3620_v2, 0 }
 0x380   : > { %5485 = vmatpush3.bf16.xpose.msra.mxu1 %v3774_v4  ;;  %v6967_v29 = vmul.f32 %v6780_v12, %v6780_v12 }
 0x381   : > { %5496 = vmatprep.subr.bf16.mxu1 %v7376_v0 }
 0x387   : > { %5487 = vmatmul.mubr.msk.bf16.vlgmr.msra.gmra.mrb[64].mxu1 %vm397_vm1, %v6945_v23 }
 0x388   : > { %5497 = vmatpush3.bf16.xpose.msra.mxu1 %v3862_v6  ;;  %5498 = vmatprep.mubr.msk.bf16.mxu1 %vm6127_vm0, %v7376_v0 }
 0x389   : > { %5508 = vmatprep.subr.bf16.mxu1 %v7376_v0 }
 0x38f   : > { %5499 = vmatmul.mubr.msk.bf16.vlgmr.msra.gmra.mrb[60].mxu1 %vm397_vm1, %v6945_v23 }
 0x390   : > { %5509 = vmatpush3.bf16.xpose.msra.mxu1 %v3950_v25  ;;  %5510 = vmatprep.mubr.msk.bf16.mxu1 %vm6127_vm0, %v7376_v0 }
 0x391   : > { %5520 = vmatprep.subr.bf16.mxu1 %v7376_v0 }
 0x397   : > { %5511 = vmatmul.mubr.msk.bf16.vlgmr.msra.gmra.mrb[64].mxu1 %vm397_vm1, %v6945_v23 }
 0x398   : > { %5521 = vmatpush3.bf16.xpose.msra.mxu1 %v3862_v6  ;;  %5522 = vmatprep.mubr.msk.bf16.mxu1 %vm6127_vm0, %v7376_v0  ;;  %v7052_v6 = vmul.f32 %v6801_v62, %v6801_v62 }
 0x399   : > { %5532 = vmatprep.subr.bf16.mxu1 %v7376_v0 }
 0x3d8   : > { %v5256_v24 = vpop.f32.mrb[16].mxu0 }
 0x3d9   : > { %v6960_v45 = vmul.f32 %v5256_v24, %v5256_v24  ;;  %v6963_v27 = vmul.f32 %v6780_v12, %v5256_v24  ;;  %v1956_v28 = vpop.f32.mrb[17].mxu0  ;;  %v7044_v24 = vmul.f32 %v6793_v60, %v6793_v60 }
 0x3da   : > { %v6969_v33 = vmul.f32 %v1956_v28, %v1956_v28  ;;  %v6972_v7 = vmul.f32 %v6784_v53, %v1956_v28  ;;  %v5257_v8 = vpop.f32.mrb[18].mxu0  ;;  %v7048_v28 = vmul.f32 %v6797_v51, %v6797_v51 }
 0x3db   : > { %v6980_v32 = vmul.f32 %v5257_v8, %v5257_v8  ;;  %v6983_v48 = vmul.f32 %v6788_v55, %v5257_v8  ;;  %v1959_v12 = vpop.f32.mrb[19].mxu0  ;;  %v6989_v49 = vadd.f32 %v6960_v45, %v6967_v29 }
 0x3dc   : > { %v6991_v15 = vmul.f32 %v1959_v12, %v1959_v12  ;;  %v6994_v54 = vmul.f32 %v6791_v58, %v1959_v12  ;;  %v6999_v53 = vadd.f32 %v6969_v33, %v6978_v39  ;;  %v7060_v12 = vmul.f32 %v6804_v9, %v6804_v9 }
 0x3dd   : > { %v7011_v43 = vadd.f32 %v6980_v32, %v7003_v56 }
 0x3de   : > { %v7015_v44 = vadd.f32 %v6991_v15, %v7007_v61 }
 0x3e0   : > { %v5260_v10 = vpop.f32.mrb[20].mxu0 }
 0x3e1   : > { %v7018_v13 = vmul.f32 %v6793_v60, %v5260_v10  ;;  %v1972_v14 = vpop.f32.mrb[21].mxu0  ;;  %v7020_v2 = vmul.f32 %v5260_v10, %v5260_v10  ;;  %v7077_v10 = vld [vmem:[%s7369_s3] sm:$0xff]  }
 0x3e2   : > { %v7023_v55 = vmul.f32 %v6797_v51, %v1972_v14  ;;  %v5261_v58 = vpop.f32.mrb[22].mxu0  ;;  %v7027_v20 = vmul.f32 %v1972_v14, %v1972_v14  ;;  %5523 = vmatmul.mubr.msk.bf16.vlgmr.msra.gmra.mrb[60].mxu1 %vm397_vm1, %v7077_v10 }
 0x3e3   : > { %7400 = vst [vmem:[#allocation16_spill] sm:$0xff] %v7018_v13  ;;  %v7029_v21 = vmul.f32 %v5261_v58, %v5261_v58  ;;  %v7032_v17 = vmul.f32 %v6801_v62, %v5261_v58  ;;  %v1975_v18 = vpop.f32.mrb[23].mxu0  ;;  %v7056_v8 = vadd.f32 %v7020_v2, %v7044_v24  ;;  %5533 = vmatpush3.bf16.xpose.msra.mxu1 %v3950_v25 }
 0x3e4   : > { %7401 = vst [vmem:[#allocation17_spill] sm:$0xff] %v7023_v55  ;;  %v7036_v22 = vmul.f32 %v1975_v18, %v1975_v18  ;;  %v7039_v4 = vmul.f32 %v6804_v9, %v1975_v18  ;;  %v7064_v60 = vadd.f32 %v7027_v20, %v7048_v28  ;;  %5534 = vmatprep.mubr.msk.bf16.mxu1 %vm6127_vm0, %v7376_v0 }
 0x3e5   : > { %7402 = vst [vmem:[#allocation18_spill] sm:$0xff] %v7032_v17  ;;  %v7068_v51 = vadd.f32 %v7029_v21, %v7052_v6 }
 0x3e6   : > { %7403 = vst [vmem:[#allocation19_spill] sm:$0xff] %v7039_v4  ;;  %v7072_v62 = vadd.f32 %v7036_v22, %v7060_v12 }
 0x3ea   : > { %5535 = vmatmul.mubr.msk.bf16.vlgmr.msra.gmra.mrb[64].mxu1 %vm397_vm1, %v7077_v10 }
 0x408   : > { %v2413_v9 = vpop.f32.mrb[24].mxu0 }
 0x409   : > { %v5314_v14 = vpop.f32.mrb[25].mxu0 }
 0x40a   : > { %v2416_v58 = vpop.f32.mrb[26].mxu0 }
 0x40b   : > { %v2551_v18 = vpack.c.bf16 %v2416_v58, %v2413_v9  ;;  %v5315_v38 = vpop.f32.mrb[27].mxu0 }
 0x40d   : > { %v2555_v42 = vunpack.c.l.bf16 %v2551_v18  ;;  %v2556_v16 = vunpack.c.h.bf16 %v2551_v18  ;;  %5336 = vmatprep.mubr.msk.bf16.mxu0 %vm397_vm1, %v2551_v18 }
 0x40e   : > { %5337 = vmatmul.mubr.msk.bf16.vlgmr.msra.gmra.mrb[32].mxu0 %vm397_vm1, %v6849_v26 }
 0x40f   : > { %v2563_v41 = vsub.f32 %v2413_v9, %v2555_v42  ;;  %v2564_v25 = vsub.f32 %v2416_v58, %v2556_v16  ;;  %5345 = vmatpush3.bf16.msra.mxu0 %v7088_v47 }
 0x410   : > { %v2495_v0 = vpop.f32.mrb[28].mxu0  ;;  %5354 = vmatprep.subr.bf16.mxu0 %v7088_v47 }
 0x411   : > { %v2571_v14 = vpack.c.bf16 %v2564_v25, %v2563_v41  ;;  %v5326_v34 = vpop.f32.mrb[29].mxu0  ;;  %v5918_v25 = vld [vmem:[%s6388_s16 + $0x20] sm:$0xff] }
 0x412   : > { %v2498_v4 = vpop.f32.mrb[30].mxu0  ;;  %v7103_v34 = vld [vmem:[%s7371_s5] sm:$0xff]  }
 0x413   : > { %v2553_v38 = vpack.c.bf16 %v2498_v4, %v2495_v0  ;;  %v5327_v17 = vpop.f32.mrb[31].mxu0 }
 0x415   : > { %v2559_v55 = vunpack.c.l.bf16 %v2553_v38  ;;  %v2560_v13 = vunpack.c.h.bf16 %v2553_v38  ;;  %5340 = vmatprep.mubr.msk.bf16.mxu0 %vm397_vm1, %v2553_v38 }
 0x416   : > { %5341 = vmatmul.mubr.msk.bf16.gmra.mrb[36].mxu0 %vm397_vm1, %v6865_v37 }
 0x417   : > { %v2567_v16 = vsub.f32 %v2495_v0, %v2559_v55  ;;  %v2568_v42 = vsub.f32 %v2498_v4, %v2560_v13  ;;  %5346 = vmatprep.mubr.msk.bf16.mxu0 %vm397_vm1, %v2551_v18  ;;  %v7404_v0 = vpack.c.bf16 %v6856_v31, %v6854_v30  ;;  %v5914_v30 = vld [vmem:[%s6388_s16] sm:$0xff]  ;;  %v7407_v18 = vpack.c.bf16 %v6901_v50, %v6899_v59 }
 0x418   : > { %v5915_v31 = vld [vmem:[%s6395_s7] sm:$0xff]  ;;  %v7409_v59 = vpack.c.bf16 %v6921_v5, %v6919_v3 }
 0x419   : > { %v2573_v9 = vpack.c.bf16 %v2568_v42, %v2567_v16  ;;  %v5921_v16 = vld [vmem:[%s6395_s7 + $0x28] sm:$0xff] }
 0x41e   : > { %5347 = vmatmul.mubr.msk.bf16.vlgmr.msra.gmra.mrb[32].mxu0 %vm397_vm1, %v6849_v26  ;;  %v7405_v26 = vpack.c.bf16 %v6872_v46, %v6870_v40  ;;  %v5916_v40 = vld [vmem:[%s6388_s16 + $0x8] sm:$0xff] }
 0x41f   : > { %5350 = vmatprep.mubr.msk.bf16.mxu0 %vm397_vm1, %v2553_v38  ;;  %5355 = vmatpush3.bf16.msra.mxu0 %v7088_v47  ;;  %v5917_v46 = vld [vmem:[%s6395_s7 + $0x8] sm:$0xff] }
 0x420   : > { %5436 = vmatprep.subr.bf16.mxu0 %v7103_v34  ;;  %v3610_v41 = vmul.f32 %v5917_v46, %v5916_v40  ;;  %v5920_v38 = vld [vmem:[%s6388_s16 + $0x28] sm:$0xff] }
 0x421   : > { %v3614_v42 = vmul.f32 %v5921_v16, %v5920_v38 }
 0x426   : > { %5351 = vmatmul.mubr.msk.bf16.gmra.mrb[36].mxu0 %vm397_vm1, %v6865_v37  ;;  %v3609_v37 = vmul.f32 %v5915_v31, %v5914_v30 }
 0x427   : > { %5356 = vmatprep.mubr.msk.bf16.mxu0 %vm397_vm1, %v2571_v14  ;;  %v5919_v14 = vld [vmem:[%s6395_s7 + $0x20] sm:$0xff]  ;;  %s4587_s7 = scalar_lea.sflag [#allocation4], %s6384_s4 }
 0x428   : > { %v3617_v13 = vpack.c.bf16 %v3610_v41, %v3609_v37 }
 0x42a   : > { %v3621_v55 = vunpack.c.l.bf16 %v3617_v13  ;;  %v3622_v17 = vunpack.c.h.bf16 %v3617_v13  ;;  %v3818_v3 = vsel %vm397_vm1, %v3617_v13, 0 }
 0x42c   : > { %v3629_v4 = vsub.f32 %v3609_v37, %v3621_v55  ;;  %v3630_v58 = vsub.f32 %v3610_v41, %v3622_v17  ;;  %v7410_v37 = vpack.c.bf16 %v6931_v36, %v6929_v35 }
 0x42e   : > { %5357 = vmatmul.mubr.msk.bf16.vlgmr.msra.gmra.mrb[32].mxu0 %vm397_vm1, %v7404_v0 }
 0x42f   : > { %5360 = vmatprep.mubr.msk.bf16.mxu0 %vm397_vm1, %v2573_v9  ;;  %5437 = vmatpush3.bf16.msra.mxu0 %v7103_v34 }
 0x430   : > { %5446 = vmatprep.subr.bf16.mxu0 %v7088_v47 }
 0x436   : > { %5361 = vmatmul.mubr.msk.bf16.gmra.mrb[36].mxu0 %vm397_vm1, %v7405_v26  ;;  %v7408_v26 = vpack.c.bf16 %v6911_v1, %v6909_v11 }
 0x437   : > { %5438 = vmatprep.mubr.msk.bf16.mxu0 %vm397_vm1, %v6895_v52 }
 0x43e   : > { %5439 = vmatmul.mubr.msk.bf16.vlgmr.msra.gmra.mrb[40].mxu0 %vm397_vm1, %v6905_v63 }
 0x43f   : > { %5442 = vmatprep.mubr.msk.bf16.mxu0 %vm397_vm1, %v6915_v19  ;;  %5447 = vmatpush3.bf16.msra.mxu0 %v7088_v47 }
 0x440   : > { %5456 = vmatprep.subr.bf16.mxu0 %v7088_v47 }
 0x446   : > { %5443 = vmatmul.mubr.msk.bf16.gmra.mrb[44].mxu0 %vm397_vm1, %v6925_v57 }
 0x447   : > { %5448 = vmatprep.mubr.msk.bf16.mxu0 %vm397_vm1, %v6895_v52  ;;  %v7406_v52 = vmov 0.0  }
 0x44e   : > { %5449 = vmatmul.mubr.msk.bf16.vlgmr.msra.gmra.mrb[40].mxu0 %vm397_vm1, %v6905_v63  ;;  %v3637_v63 = vpack.c.bf16 %v3630_v58, %v3629_v4 }
 0x44f   : > { %5452 = vmatprep.mubr.msk.bf16.mxu0 %vm397_vm1, %v6915_v19  ;;  %5457 = vmatpush3.bf16.msra.mxu0 %v7088_v47  ;;  %v3613_v19 = vmul.f32 %v5919_v14, %v5918_v25 }
 0x450   : > { %5466 = vmatprep.subr.bf16.mxu0 %v7406_v52  ;;  %v3642_v9 = vsel %vm397_vm1, %v3637_v63, 0 }
 0x451   : > { %v3619_v0 = vpack.c.bf16 %v3614_v42, %v3613_v19 }
 0x453   : > { %v3625_v50 = vunpack.c.l.bf16 %v3619_v0  ;;  %v3906_v5 = vsel %vm397_vm1, %v3619_v0, 0 }
 0x455   : > { %v3633_v30 = vsub.f32 %v3613_v19, %v3625_v50 }
 0x456   : > { %5453 = vmatmul.mubr.msk.bf16.gmra.mrb[44].mxu0 %vm397_vm1, %v6925_v57  ;;  %v3626_v57 = vunpack.c.h.bf16 %v3619_v0 }
 0x457   : > { %5458 = vmatprep.mubr.msk.bf16.mxu0 %vm397_vm1, %v7407_v18 }
 0x458   : > { %v3634_v31 = vsub.f32 %v3614_v42, %v3626_v57 }
 0x45a   : > { %v3639_v11 = vpack.c.bf16 %v3634_v31, %v3633_v30 }
 0x45c   : > { %v3730_v1 = vsel %vm397_vm1, %v3639_v11, 0 }
 0x45e   : > { %5459 = vmatmul.mubr.msk.bf16.vlgmr.msra.gmra.mrb[40].mxu0 %vm397_vm1, %v7408_v26 }
 0x45f   : > { %5462 = vmatprep.mubr.msk.bf16.mxu0 %vm397_vm1, %v7409_v59  ;;  %5467 = vmatpush3.bf16.xpose.msra.mxu0 %v3642_v9 }
 0x460   : > { %5478 = vmatprep.subr.bf16.mxu0 %v7406_v52 }
 0x466   : > { %5463 = vmatmul.mubr.msk.bf16.gmra.mrb[44].mxu0 %vm397_vm1, %v7410_v37 }
 0x467   : > { %5468 = vmatprep.mubr.msk.bf16.mxu0 %vm6127_vm0, %v7406_v52 }
 0x46e   : > { %5469 = vmatmul.mubr.msk.bf16.vlgmr.msra.gmra.mrb[48].mxu0 %vm397_vm1, %v6945_v23 }
 0x46f   : > { %5479 = vmatpush3.bf16.xpose.msra.mxu0 %v3730_v1  ;;  %5480 = vmatprep.mubr.msk.bf16.mxu0 %vm6127_vm0, %v7406_v52 }
 0x470   : > { %5490 = vmatprep.subr.bf16.mxu0 %v7406_v52 }
 0x476   : > { %5481 = vmatmul.mubr.msk.bf16.vlgmr.msra.gmra.mrb[52].mxu0 %vm397_vm1, %v6945_v23 }
 0x477   : > { %5491 = vmatpush3.bf16.xpose.msra.mxu0 %v3818_v3  ;;  %5492 = vmatprep.mubr.msk.bf16.mxu0 %vm6127_vm0, %v7406_v52 }
 0x478   : > { %5502 = vmatprep.subr.bf16.mxu0 %v7406_v52 }
 0x47e   : > { %5493 = vmatmul.mubr.msk.bf16.vlgmr.msra.gmra.mrb[48].mxu0 %vm397_vm1, %v6945_v23 }
 0x47f   : > { %5503 = vmatpush3.bf16.xpose.msra.mxu0 %v3906_v5  ;;  %5504 = vmatprep.mubr.msk.bf16.mxu0 %vm6127_vm0, %v7406_v52 }
 0x480   : > { %5514 = vmatprep.subr.bf16.mxu0 %v7406_v52 }
 0x486   : > { %5505 = vmatmul.mubr.msk.bf16.vlgmr.msra.gmra.mrb[52].mxu0 %vm397_vm1, %v6945_v23 }
 0x487   : > { %5515 = vmatpush3.bf16.xpose.msra.mxu0 %v3818_v3  ;;  %5516 = vmatprep.mubr.msk.bf16.mxu0 %vm6127_vm0, %v7406_v52 }
 0x488   : > { %5526 = vmatprep.subr.bf16.mxu0 %v7406_v52 }
 0x48e   : > { %5517 = vmatmul.mubr.msk.bf16.vlgmr.msra.gmra.mrb[48].mxu0 %vm397_vm1, %v7077_v10 }
 0x48f   : > { %5527 = vmatpush3.bf16.xpose.msra.mxu0 %v3906_v5  ;;  %5528 = vmatprep.mubr.msk.bf16.mxu0 %vm6127_vm0, %v7406_v52 }
 0x490   : > { %5538 = vmatprep.subr.bf16.mxu0 %v7103_v34 }
 0x496   : > { %5529 = vmatmul.mubr.msk.bf16.vlgmr.msra.gmra.mrb[52].mxu0 %vm397_vm1, %v7077_v10 }
 0x497   : > { %5539 = vmatpush3.bf16.msra.mxu0 %v7103_v34 }
 0x498   : > { %5548 = vmatprep.subr.bf16.mxu0 %v7088_v47 }
 0x4b5   : > { %v4068_v35 = vpop.f32.mrb[60].mxu1 }
 0x4b6   : > { %v5524_v36 = vpop.f32.mrb[61].mxu1 }
 0x4b7   : > { %v4071_v23 = vpop.f32.mrb[62].mxu1 }
 0x4b8   : > { %v7200_v40 = vpack.c.bf16 %v4071_v23, %v4068_v35  ;;  %v5525_v46 = vpop.f32.mrb[63].mxu1 }
 0x4ba   : > { %v4171_v41 = vunpack.c.l.bf16 %v7200_v40  ;;  %v4172_v13 = vunpack.c.h.bf16 %v7200_v40 }
 0x4bc   : > { %v7204_v55 = vsub.f32 %v4068_v35, %v4171_v41  ;;  %v7206_v17 = vsub.f32 %v4071_v23, %v4172_v13  ;;  %v4514_v13 = vadd.f32 0.0001, %v6989_v49 }
 0x4bd   : > { %v4150_v52 = vpop.f32.mrb[64].mxu1 }
 0x4be   : > { %v5536_v10 = vpop.f32.mrb[65].mxu1  ;;  %v4186_v34 = vpack.c.bf16 %v7206_v17, %v7204_v55  ;;  %v4467_v17 = vmul.f32 2.0, %v6983_v48 }
 0x4bf   : > { %v4153_v4 = vpop.f32.mrb[66].mxu1 }
 0x4c0   : > { %v7210_v58 = vpack.c.bf16 %v4153_v4, %v4150_v52  ;;  %v5537_v18 = vpop.f32.mrb[67].mxu1 }
 0x4c2   : > { %v4175_v63 = vunpack.c.l.bf16 %v7210_v58  ;;  %v4176_v25 = vunpack.c.h.bf16 %v7210_v58 }
 0x4c4   : > { %v7214_v14 = vsub.f32 %v4150_v52, %v4175_v63  ;;  %v7216_v19 = vsub.f32 %v4153_v4, %v4176_v25  ;;  %v4513_v63 = vadd.f32 0.0001, %v7015_v44 }
 0x4c6   : > { %v4188_v38 = vpack.c.bf16 %v7216_v19, %v7214_v14 }
 0x501   : > { %v5358_v16 = vpop.f32.mrb[32].mxu0 }
 0x502   : > { %v4442_v42 = vsub.f32 %v5358_v16, %v6967_v29  ;;  %v2763_v9 = vpop.f32.mrb[33].mxu0 }
 0x503   : > { %v4440_v0 = vsub.f32 %v2763_v9, %v6978_v39  ;;  %v5359_v26 = vpop.f32.mrb[34].mxu0 }
 0x504   : > { %v4443_v59 = vsub.f32 %v5359_v26, %v7003_v56  ;;  %v2766_v50 = vpop.f32.mrb[35].mxu0 }
 0x505   : > { %v4441_v57 = vsub.f32 %v2766_v50, %v7007_v61 }
 0x509   : > { %v5362_v30 = vpop.f32.mrb[36].mxu0 }
 0x50a   : > { %v4446_v31 = vsub.f32 %v5362_v30, %v7044_v24  ;;  %v2779_v37 = vpop.f32.mrb[37].mxu0 }
 0x50b   : > { %v4444_v11 = vsub.f32 %v2779_v37, %v7048_v28  ;;  %v5363_v1 = vpop.f32.mrb[38].mxu0 }
 0x50c   : > { %v4447_v3 = vsub.f32 %v5363_v1, %v7052_v6  ;;  %v2782_v5 = vpop.f32.mrb[39].mxu0  ;;  %v4516_v1 = vadd.f32 0.0001, %v7064_v60 }
 0x50d   : > { %v4445_v29 = vsub.f32 %v2782_v5, %v7060_v12  ;;  %v4512_v12 = vadd.f32 0.0001, %v6999_v53 }
 0x531   : > { %v5460_v35 = vpop.f32.mrb[40].mxu0 }
 0x532   : > { %v4450_v39 = vsub.f32 %v5460_v35, %v6960_v45  ;;  %v3570_v36 = vpop.f32.mrb[41].mxu0  ;;  %v4515_v45 = vadd.f32 0.0001, %v7011_v43  ;;  %v4519_v35 = vadd.f32 0.0001, %v7068_v51 }
 0x533   : > { %v4448_v56 = vsub.f32 %v3570_v36, %v6969_v33  ;;  %v5461_v23 = vpop.f32.mrb[42].mxu0 }
 0x534   : > { %v4522_v61 = vadd.f32 %v4450_v39, %v4442_v42  ;;  %v4451_v46 = vsub.f32 %v5461_v23, %v6980_v32  ;;  %v3573_v24 = vpop.f32.mrb[43].mxu0 }
 0x535   : > { %v4520_v41 = vadd.f32 %v4448_v56, %v4440_v0  ;;  %v4449_v28 = vsub.f32 %v3573_v24, %v6991_v15 }
 0x536   : > { %v4530_v6 = vadd.f32 0.0009, %v4522_v61  ;;  %v4523_v52 = vadd.f32 %v4451_v46, %v4443_v59 }
 0x537   : > { %v4528_v10 = vadd.f32 0.0009, %v4520_v41  ;;  %v4521_v4 = vadd.f32 %v4449_v28, %v4441_v57  ;;  %v4518_v57 = vadd.f32 0.0001, %v7056_v8 }
 0x538   : > { %v7235_v18 = vmul.f32 %v4530_v6, %v4514_v13  ;;  %v4531_v33 = vadd.f32 0.0009, %v4523_v52 }
 0x539   : > { %v7238_v32 = vmul.f32 %v4528_v10, %v4512_v12  ;;  %v4529_v25 = vadd.f32 0.0009, %v4521_v4  ;;  %v5464_v16 = vpop.f32.mrb[44].mxu0 }
 0x53a   : > { %v7240_v15 = vmul.f32 %v4531_v33, %v4515_v45  ;;  %v4454_v49 = vsub.f32 %v5464_v16, %v7020_v2  ;;  %v3586_v42 = vpop.f32.mrb[45].mxu0  ;;  %5890 = vrcp.f32 %v7235_v18 }
 0x53b   : > { %v7243_v9 = vmul.f32 %v4529_v25, %v4513_v63  ;;  %v4452_v53 = vsub.f32 %v3586_v42, %v7027_v20  ;;  %v5465_v0 = vpop.f32.mrb[46].mxu0  ;;  %5892 = vrcp.f32 %v7238_v32 }
 0x53c   : > { %v4526_v43 = vadd.f32 %v4454_v49, %v4446_v31  ;;  %v4455_v26 = vsub.f32 %v5465_v0, %v7029_v21  ;;  %v3589_v59 = vpop.f32.mrb[47].mxu0  ;;  %v4517_v31 = vadd.f32 0.0001, %v7072_v62  ;;  %5894 = vrcp.f32 %v7240_v15 }
 0x53d   : > { %v4524_v50 = vadd.f32 %v4452_v53, %v4444_v11  ;;  %v4453_v44 = vsub.f32 %v3589_v59, %v7036_v22  ;;  %5896 = vrcp.f32 %v7243_v9  ;;  %v4475_v49 = vadd.f32 0.0001, %v4467_v17  ;;  %v7411_v53 = vld [vmem:[#allocation16_spill] sm:$0xff] }
 0x53e   : > { %v4534_v30 = vadd.f32 0.0009, %v4526_v43  ;;  %v4527_v37 = vadd.f32 %v4455_v26, %v4447_v3 }
 0x53f   : > { %v4532_v2 = vadd.f32 0.0009, %v4524_v50  ;;  %v4525_v5 = vadd.f32 %v4453_v44, %v4445_v29  ;;  %v7412_v50 = vld [vmem:[#allocation17_spill] sm:$0xff] }
 0x540   : > { %v7251_v39 = vmul.f32 %v4534_v30, %v4518_v57  ;;  %v4535_v20 = vadd.f32 0.0009, %v4527_v37  ;;  %v4468_v44 = vmul.f32 2.0, %v7412_v50 }
 0x541   : > { %v7254_v21 = vmul.f32 %v4532_v2, %v4516_v1  ;;  %v4533_v11 = vadd.f32 0.0009, %v4525_v5 }
 0x542   : > { %v7256_v36 = vmul.f32 %v4535_v20, %v4519_v35  ;;  %5898 = vrcp.f32 %v7251_v39 }
 0x543   : > { %v7258_v22 = vmul.f32 %v4533_v11, %v4517_v31  ;;  %5900 = vrcp.f32 %v7254_v21 }
 0x544   : > { %v5891_v59 = vpop.eup %5890  ;;  %5902 = vrcp.f32 %v7256_v36  ;;  %v7413_v36 = vld [vmem:[#allocation18_spill] sm:$0xff] }
 0x545   : > { %v5893_v37 = vpop.eup %5892  ;;  %5904 = vrcp.f32 %v7258_v22 }
 0x546   : > { %v5895_v39 = vpop.eup %5894 }
 0x561   : > { %v4027_v8 = vpop.f32.mrb[48].mxu0 }
 0x562   : > { %v5518_v3 = vpop.f32.mrb[49].mxu0 }
 0x563   : > { %v4030_v56 = vpop.f32.mrb[50].mxu0  ;;  %v5897_v3 = vpop.eup %5896 }
 0x564   : > { %v4165_v60 = vpack.c.bf16 %v4030_v56, %v4027_v8  ;;  %v5519_v23 = vpop.f32.mrb[51].mxu0 }
 0x566   : > { %v4169_v29 = vunpack.c.l.bf16 %v4165_v60  ;;  %v4170_v61 = vunpack.c.h.bf16 %v4165_v60  ;;  %5540 = vmatprep.mubr.msk.bf16.mxu0 %vm397_vm1, %v4165_v60 }
 0x567   : > { %5541 = vmatmul.mubr.msk.bf16.vlgmr.msra.gmra.mrb[56].mxu0 %vm397_vm1, %v7200_v40 }
 0x568   : > { %v4177_v51 = vsub.f32 %v4027_v8, %v4169_v29  ;;  %v4178_v62 = vsub.f32 %v4030_v56, %v4170_v61  ;;  %5549 = vmatpush3.bf16.msra.mxu0 %v7088_v47  ;;  %v4471_v56 = vmul.f32 2.0, %v7413_v36  ;;  %v7414_v61 = vld [vmem:[#allocation19_spill] sm:$0xff] }
 0x569   : > { %v4109_v46 = vpop.f32.mrb[52].mxu0  ;;  %5558 = vmatprep.subr.bf16.mxu0 %v7088_v47 }
 0x56a   : > { %v4185_v24 = vpack.c.bf16 %v4178_v62, %v4177_v51  ;;  %v5530_v41 = vpop.f32.mrb[53].mxu0  ;;  %v4469_v51 = vmul.f32 2.0, %v7414_v61 }
 0x56b   : > { %v4112_v28 = vpop.f32.mrb[54].mxu0  ;;  %v4476_v41 = vadd.f32 0.0001, %v4468_v44 }
 0x56c   : > { %v4167_v13 = vpack.c.bf16 %v4112_v28, %v4109_v46  ;;  %v5531_v6 = vpop.f32.mrb[55].mxu0  ;;  %v4477_v17 = vadd.f32 0.0001, %v4469_v51 }
 0x56e   : > { %v4173_v52 = vunpack.c.l.bf16 %v4167_v13  ;;  %v4174_v12 = vunpack.c.h.bf16 %v4167_v13  ;;  %5544 = vmatprep.mubr.msk.bf16.mxu0 %vm397_vm1, %v4167_v13 }
 0x56f   : > { %5545 = vmatmul.mubr.msk.bf16.gmra.mrb[60].mxu0 %vm397_vm1, %v7210_v58 }
 0x570   : > { %v4181_v10 = vsub.f32 %v4109_v46, %v4173_v52  ;;  %v4182_v4 = vsub.f32 %v4112_v28, %v4174_v12  ;;  %5550 = vmatprep.mubr.msk.bf16.mxu0 %vm397_vm1, %v4165_v60 }
 0x572   : > { %v4187_v45 = vpack.c.bf16 %v4182_v4, %v4181_v10  ;;  %v4479_v4 = vadd.f32 0.0001, %v4471_v56 }
 0x577   : > { %5551 = vmatmul.mubr.msk.bf16.vlgmr.msra.gmra.mrb[56].mxu0 %vm397_vm1, %v7200_v40  ;;  %v4464_v40 = vmul.f32 2.0, %v6972_v7 }
 0x578   : > { %5554 = vmatprep.mubr.msk.bf16.mxu0 %vm397_vm1, %v4167_v13  ;;  %5559 = vmatpush3.bf16.msra.mxu0 %v7088_v47  ;;  %v4466_v47 = vmul.f32 2.0, %v6963_v27 }
 0x579   : > { %v4472_v25 = vadd.f32 0.0001, %v4464_v40 }
 0x57a   : > { %v4474_v32 = vadd.f32 0.0001, %v4466_v47 }
 0x57f   : > { %5555 = vmatmul.mubr.msk.bf16.gmra.mrb[60].mxu0 %vm397_vm1, %v7210_v58 }
 0x580   : > { %5560 = vmatprep.mubr.msk.bf16.mxu0 %vm397_vm1, %v4185_v24 }
 0x587   : > { %5561 = vmatmul.mubr.msk.bf16.vlgmr.msra.gmra.mrb[56].mxu0 %vm397_vm1, %v4186_v34 }
 0x588   : > { %5564 = vmatprep.mubr.msk.bf16.mxu0 %vm397_vm1, %v4187_v45 }
 0x58f   : > { %5565 = vmatmul.mubr.msk.bf16.gmra.mrb[60].mxu0 %vm397_vm1, %v4188_v38  ;;  %v4465_v38 = vmul.f32 2.0, %v6994_v54 }
 0x591   : > { %v4473_v43 = vadd.f32 0.0001, %v4465_v38 }
 0x65a   : > { %v5562_v55 = vpop.f32.mrb[56].mxu0 }
 0x65b   : > { %v4458_v34 = vsub.f32 %v5562_v55, %v6963_v27  ;;  %v4377_v58 = vpop.f32.mrb[57].mxu0  ;;  %v4470_v27 = vmul.f32 2.0, %v7411_v53  ;;  %v5899_v55 = vpop.eup %5898 }
 0x65c   : > { %v4456_v14 = vsub.f32 %v4377_v58, %v6972_v7  ;;  %v5563_v19 = vpop.f32.mrb[58].mxu0 }
 0x65d   : > { %v4482_v18 = vmul.f32 2.0, %v4458_v34  ;;  %v4459_v33 = vsub.f32 %v5563_v19, %v6983_v48  ;;  %v4380_v63 = vpop.f32.mrb[59].mxu0  ;;  %v4478_v20 = vadd.f32 0.0001, %v4470_v27  ;;  %v5901_v19 = vpop.eup %5900 }
 0x65e   : > { %v4480_v16 = vmul.f32 2.0, %v4456_v14  ;;  %v4457_v15 = vsub.f32 %v4380_v63, %v6994_v54  ;;  %v5903_v63 = vpop.eup %5902 }
 0x65f   : > { %v4490_v42 = vadd.f32 0.0009, %v4482_v18  ;;  %v4483_v9 = vmul.f32 2.0, %v4459_v33 }
 0x660   : > { %v4488_v7 = vadd.f32 0.0009, %v4480_v16  ;;  %v4481_v0 = vmul.f32 2.0, %v4457_v15  ;;  %v5905_v15 = vpop.eup %5904 }
 0x661   : > { %v4498_v26 = vmul.f32 %v4490_v42, %v4474_v32  ;;  %v4491_v48 = vadd.f32 0.0009, %v4483_v9 }
 0x662   : > { %v4496_v54 = vmul.f32 %v4488_v7, %v4472_v25  ;;  %v4489_v57 = vadd.f32 0.0009, %v4481_v0  ;;  %v5566_v30 = vpop.f32.mrb[60].mxu0 }
 0x663   : > { %v4554_v1 = vmul.f32 %v5891_v59, %v4498_v26  ;;  %v4499_v2 = vmul.f32 %v4491_v48, %v4475_v49  ;;  %v4462_v5 = vsub.f32 %v5566_v30, %v7411_v53  ;;  %v4393_v35 = vpop.f32.mrb[61].mxu0 }
 0x664   : > { %v4552_v31 = vmul.f32 %v5893_v37, %v4496_v54  ;;  %v4497_v21 = vmul.f32 %v4489_v57, %v4473_v43  ;;  %v4460_v11 = vsub.f32 %v4393_v35, %v7412_v50  ;;  %v5567_v8 = vpop.f32.mrb[62].mxu0 }
 0x665   : > { %v4555_v60 = vmul.f32 %v5895_v39, %v4499_v2  ;;  %v4486_v23 = vmul.f32 2.0, %v4462_v5  ;;  %v4463_v29 = vsub.f32 %v5567_v8, %v7413_v36  ;;  %v4396_v22 = vpop.f32.mrb[63].mxu0  ;;  %v4563_v34 = vsel %vm397_vm1, %v4554_v1, 0.0 }
 0x666   : > { %v4553_v62 = vmul.f32 %v5897_v3, %v4497_v21  ;;  %v4484_v46 = vmul.f32 2.0, %v4460_v11  ;;  %v4461_v24 = vsub.f32 %v4396_v22, %v7414_v61  ;;  %v4560_v6 = vsel %vm397_vm1, %v4552_v31, 0.0 }
 0x667   : > { %v4494_v28 = vadd.f32 0.0009, %v4486_v23  ;;  %v4487_v13 = vmul.f32 2.0, %v4463_v29  ;;  %v4565_v32 = vsel %vm397_vm1, %v4555_v60, 0.0 }
 0x668   : > { %v4561_v52 = vsel %vm397_vm1, %v4553_v62, 0.0  ;;  %v4492_v12 = vadd.f32 0.0009, %v4484_v46  ;;  %v4485_v10 = vmul.f32 2.0, %v4461_v24 }
 0x669   : > { %v4562_v45 = vadd.f32 %v4561_v52, %v4560_v6  ;;  %v4502_v47 = vmul.f32 %v4494_v28, %v4478_v20  ;;  %v4495_v40 = vadd.f32 0.0009, %v4487_v13 }
 0x66a   : > { %v4500_v58 = vmul.f32 %v4492_v12, %v4476_v41  ;;  %v4493_v14 = vadd.f32 0.0009, %v4485_v10 }
 0x66b   : > { %v4503_v38 = vmul.f32 %v4495_v40, %v4479_v4  ;;  %v4558_v18 = vmul.f32 %v5899_v55, %v4502_v47  ;;  %v4564_v33 = vadd.f32 %v4563_v34, %v4562_v45 }
 0x66c   : > { %v4556_v25 = vmul.f32 %v5901_v19, %v4500_v58  ;;  %v4501_v16 = vmul.f32 %v4493_v14, %v4477_v17 }
 0x66d   : > { %v4559_v49 = vmul.f32 %v5903_v63, %v4503_v38  ;;  %v4566_v42 = vadd.f32 %v4565_v32, %v4564_v33  ;;  %v4571_v43 = vsel %vm397_vm1, %v4558_v18, 0.0 }
 0x66e   : > { %v4557_v9 = vmul.f32 %v5905_v15, %v4501_v16  ;;  %v4567_v53 = vsel %vm397_vm1, %v4556_v25, 0.0 }
 0x66f   : > { %v4568_v27 = vadd.f32 %v4567_v53, %v4566_v42  ;;  %v4573_v48 = vsel %vm397_vm1, %v4559_v49, 0.0 }
 0x670   : > { %v4569_v7 = vsel %vm397_vm1, %v4557_v9, 0.0 }
 0x671   : > { %v4570_v0 = vadd.f32 %v4569_v7, %v4568_v27 }
 0x673   : > { %v4572_v26 = vadd.f32 %v4571_v43, %v4570_v0 }
 0x675   : > { %v4574_v59 = vadd.f32 %v4573_v48, %v4572_v26 }
 0x677   : > { %4575 = vadd.xlane.f32.xlu0 %v4574_v59 }
 0x704   : > { %v4576_v50 = vpop.xlane.xlu0 %4575 }
 0x705   : > { %v4577_v44 = vrot.slane %v4576_v50, 4 }
 0x707   : > { %v4578_v54 = vadd.f32 %v4577_v44, %v4576_v50 }
 0x709   : > { %v4579_v57 = vrot.slane %v4578_v54, 2 }
 0x70b   : > { %v4580_v30 = vadd.f32 %v4579_v57, %v4578_v54 }
 0x70d   : > { %v4581_v37 = vrot.slane %v4580_v30, 1 }
 0x70f   : > { %v4582_v1 = vadd.f32 %v4581_v37, %v4580_v30 }
 0x711   : > { %5806 = vpush %v4582_v1 }
 0x742   : > { %s5807_s10 = spop %5806 }
 0x743   : > { %v4584_v2 = vstv %s5807_s10 }
 0x744   : > { %4585 = vst [vmem:[%s340_s12] sm:$0xff] %v4584_v2 }
 0x745   : > { %6051 = shalt.err (!%p6048_p7)
}
 0x746   : > { %s6052_s4 = scalar_lea.hbm %s7324_s29, 128  ;;  %s6056_s17 = scalar_lea.hbm %s7372_s6, 256 }
 0x747   : > { %p6053_p9 = scmp.ne.s32.totalorder %s7324_s29, %s6052_s4  ;;  %p6057_p11 = scmp.lt.u32.totalorder %s7324_s29, %s7372_s6 }
 0x748   : > { %p6058_p1 = scmp.lt.u32.totalorder %s6056_s17, %s6052_s4  ;;  %p6060_p2 = scmp.lt.u32.totalorder %s6052_s4, %s7324_s29 }
 0x749   : > { %p6054_p0 = pnand %p6053_p9, %p7415_p13 }
 0x74a   : > { %p6059_p12 = por %p6058_p1, %p6057_p11 }
 0x74b   : > { %p6055_p8 = pneg %p6054_p0 }
 0x74c   : > { %p6061_p6 = por %p6060_p2, %p6059_p12 }
 0x74e   : > { %p6062_p10 = pnand %p6061_p6, %p6055_p8 }
 0x750   : > { %6065 = shalt.err (!%p6062_p10)
}
 0x751   : > { %5820 = dma.vmem_to_hbm [thread:$0]  (%p7415_p13), %s7319_s30, 128, %s7324_s29, %s4587_s7  }
 0x752 PF: > { %s4612_s13 = sand.u32 1, %s6104_s21   ;;  %p7416_p4 = scmp.ne.s32.totalorder %s7386_s28, 0 }
 0x753   : > { %p7417_p5 = scmp.ge.s32.totalorder %s6116_s24, 2  ;;  %s4613_s12 = scalar_lea.sflag [#allocation4], %s4612_s13 }
 0x755   : > { %p5837_p3 = pnand %p7417_p5, %p7416_p4 }
 0x757   : > { %6099 = dma.done.wait (!%p5837_p3), %s4613_s12, 128  }
 0x758   : > { %6101 = vsyncadd (!%p5837_p3), %s4613_s12, 4294967168  ;;  %p23_p7 = scmp.ge.s32.totalorder %s6274_s26, 4   ;;  %s7418_s21 = smov %s6108_s22 }
 0x759   : > { %s7419_s22 = smov %s6112_s23  ;;  %s7420_s23 = smov %s6290_s11 }
 0x75a   : > { %s7421_s24 = smov %s6274_s26  ;;  %25 = sbr.rel (!%p23_p7) target bundleno = 12 (0xc), region = 110 }
 0x761   :  { %4618 = vsyncpa [#allocation3], 1 }
 0x762   :  { %4620 = vsyncpa [#allocation3 + $0x1], 1 }
 0x763   :  { %4621 = vsyncpa [#allocation6], 1 }
 0x764   :  { %4623 = vsyncpa [#allocation6 + $0x1], 1 }
 0x765   :  { %4624 = vsyncpa [#allocation9], 1 }
 0x766   :  { %4625 = vsyncpa [#allocation4], 1 }
 0x767   :  { %4627 = vsyncpa [#allocation4 + $0x1], 1 }

</bundles_post_ra>
